<compile_context>
chip_gen: v7x
topology: tpu7x:2x2x1
jax: 0.10.0
libtpu: 0.0.40
codegen_flags: <defaults>
</compile_context>

<pallas_src>
import jax
import jax.numpy as jnp
from jax import lax
from jax.experimental import pallas as pl
from jax.experimental.pallas import tpu as pltpu


def stability_kernel(gx0_ref,                       # (T*B, 4H) f32  pre-activations of layer 0
                     whh0_ref,                      # (H, 4H)  bf16  [i/f/o cols pre-scaled x0.5]
                     wih1_ref, whh1_ref, b1_ref,    # (H,4H) (H,4H) bf16, (1,4H) f32 [scaled]
                     fcw1_ref, fcb1_ref,            # (H, F1) bf16, (1, F1) f32
                     fcw2_ref, fcb2_ref,            # (F1, P) bf16, (1, P) f32  (BN folded, lane-padded)
                     stab_ref,                      # (B, P)  f32  (padded stability metrics)
                     state_ref):                    # (B, 4H) f32  [h1 | h2 | c1 | c2]
    B = state_ref.shape[0]
    TB, H4 = gx0_ref.shape
    T = TB // B
    H = H4 // 4

    whh0 = whh0_ref[...]
    wih1 = wih1_ref[...]
    whh1 = whh1_ref[...]
    # Hoisted bias broadcast (JAX does not CSE broadcast_in_dim).
    b1b = jnp.broadcast_to(b1_ref[...], (B, H4))

    # Gate-column mask (True on the cell-gate "g" columns), hoisted out of the
    # time loop: one full-vreg select replaces three quarter-vreg fixups.
    col = lax.broadcasted_iota(jnp.int32, (B, H4), 1)
    g_mask = (col >= 2 * H) & (col < 3 * H)

    def gate_combine(gates, c):
        # PyTorch gate order (i, f, g, o).  i/f/o weight columns were
        # pre-scaled by 0.5 in the wrapper, so a single tanh over all 4H lanes
        # yields tanh(z/2) on the sigmoid gates and tanh(z) on the cell gate:
        #   sigmoid(z) = 0.5 * (tanh(z/2) + 1)
        th = jnp.tanh(gates)                            # single EUP pass
        th = jnp.where(g_mask, th, 0.5 * (th + 1.0))    # full-vreg sigmoid fixup
        i = th[:, 0 * H:1 * H]
        f = th[:, 1 * H:2 * H]
        g = th[:, 2 * H:3 * H]
        o = th[:, 3 * H:4 * H]
        c_new = f * c + i * g
        h_new = o * jnp.tanh(c_new)
        return h_new, c_new

    zeros = jnp.zeros((B, H), jnp.float32)
    h1, c1, h2, c2 = zeros, zeros, zeros, zeros

    # Fully unrolled time loop (T is small and static) so the LLO scheduler can
    # overlap independent work across steps.
    for t in range(T):
        # Layer 0: only the recurrent matmul remains on the critical path.
        g0 = gx0_ref[t * B:(t + 1) * B, :] + jnp.dot(
            h1.astype(jnp.bfloat16), whh0, preferred_element_type=jnp.float32)
        h1, c1 = gate_combine(g0, c1)
        # TODO(synk): inter-layer LSTM dropout (p=0.2) is identity in eval mode.
        # Layer 1: two independent MXU pushes, no lane-concat on the serial path.
        h1b = h1.astype(jnp.bfloat16)
        g1 = (jnp.dot(h1b, wih1, preferred_element_type=jnp.float32)
              + jnp.dot(h2.astype(jnp.bfloat16), whh1,
                        preferred_element_type=jnp.float32)
              + b1b)
        h2, c2 = gate_combine(g1, c2)

    # FC head applied to lstm_out[:, -1, :] == h2.
    l1 = jnp.maximum(
        jnp.dot(h2.astype(jnp.bfloat16), fcw1_ref[...],
                preferred_element_type=jnp.float32) + fcb1_ref[...], 0.0)
    # TODO(synk): FC Dropout(0.2) is identity in eval mode.
    # BatchNorm (eval, running stats) was folded into fcw2/fcb2 in the wrapper.
    out = jnp.dot(l1.astype(jnp.bfloat16), fcw2_ref[...],
                  preferred_element_type=jnp.float32) + fcb2_ref[...]

    stab_ref[...] = out                                           # lane-padded (B, 128)
    state_ref[...] = jnp.concatenate([h1, h2, c1, c2], axis=-1)   # one (8,128) store


def _prep_kernel_params(params):
    """PyTorch-layout params -> the kernel's folded / bf16 layout."""
    H = params["whh0"].shape[0]
    F1 = params["fcw1"].shape[1]
    M = params["fcw2"].shape[1]
    PAD = ((M + 127) // 128) * 128

    # Scale i, f, o gate columns (PyTorch order i,f,g,o) by 0.5 so one tanh
    # recovers the sigmoid gates.  Power-of-two scaling is exact in f32 and is
    # applied BEFORE the bf16 cast.
    gscale = jnp.concatenate(
        [jnp.full((1, H), 0.5, jnp.float32), jnp.full((1, H), 0.5, jnp.float32),
         jnp.ones((1, H), jnp.float32), jnp.full((1, H), 0.5, jnp.float32)],
        axis=1)

    wih0 = (params["wih0"] * gscale).astype(jnp.bfloat16)
    b0 = params["b0"] * gscale                              # stays f32 (added to f32 acc)
    whh0 = (params["whh0"] * gscale).astype(jnp.bfloat16)
    wih1 = (params["wih1"] * gscale).astype(jnp.bfloat16)
    whh1 = (params["whh1"] * gscale).astype(jnp.bfloat16)
    b1 = params["b1"] * gscale

    # Fold eval-mode BatchNorm (running stats) into fc2: exact affine fold.
    bn_s = params["bn_g"] * lax.rsqrt(params["bn_v"] + jnp.float32(1e-5))   # (1, F1)
    bn_o = params["bn_b"] - params["bn_m"] * bn_s                            # (1, F1)
    fcw2 = params["fcw2"] * bn_s.reshape(F1, 1)                              # row-scale
    fcb2 = bn_o @ params["fcw2"] + params["fcb2"]                            # (1, M)

    # Lane-pad the final head to a 128-multiple so the stability store is
    # unmasked; padded columns produce exact zeros (sliced off in the wrapper).
    fcw2_p = jnp.zeros((F1, PAD), jnp.float32).at[:, :M].set(fcw2).astype(jnp.bfloat16)
    fcb2_p = jnp.zeros((1, PAD), jnp.float32).at[:, :M].set(fcb2)

    kernel_args = (whh0, wih1, whh1, b1,
                   params["fcw1"].astype(jnp.bfloat16), params["fcb1"],
                   fcw2_p, fcb2_p)
    return wih0, b0, kernel_args, PAD


def stability_predictor(x, params, num_metrics=3):
    """x: (B, T, D) batch_first.  Returns (stability (B,M), (h_n, c_n) each (2,B,H))."""
    B, T, D = x.shape
    H = params["whh0"].shape[0]

    wih0, b0, kernel_args, PAD = _prep_kernel_params(params)

    # Hoisted layer-0 input projection (no recurrent dependency): one XLA gemm
    # in bf16 with f32 accumulation; the kernel receives the lane-dense
    # (T*B, 4H) pre-activation slab (time-major so per-step slabs are static,
    # 8-sublane-aligned row slices).
    x2d = jnp.transpose(x, (1, 0, 2)).reshape(T * B, D).astype(jnp.float32)
    gx0 = jnp.dot(x2d.astype(jnp.bfloat16), wih0,
                  preferred_element_type=jnp.float32) + b0              # (T*B, 4H)

    args = (gx0,) + kernel_args

    vmem = pl.BlockSpec(memory_space=pltpu.MemorySpace.VMEM)
    out_shape = (jax.ShapeDtypeStruct((B, PAD), jnp.float32),        # padded stability
                 jax.ShapeDtypeStruct((B, 4 * H), jnp.float32))      # [h1|h2|c1|c2]

    stab_pad, state = pl.pallas_call(
        stability_kernel,
        out_shape=out_shape,
        in_specs=[vmem] * len(args),
        out_specs=(vmem, vmem),
    )(*args)

    stab = stab_pad[:, :num_metrics]
    h_n = jnp.stack([state[:, 0 * H:1 * H], state[:, 1 * H:2 * H]])
    c_n = jnp.stack([state[:, 2 * H:3 * H], state[:, 3 * H:4 * H]])
    return stab, (h_n, c_n)


# ---------------------------------------------------------------------------
# Deterministic parameter construction (shapes dictated by the module __init__)
# ---------------------------------------------------------------------------
def make_params(key, input_dim, hidden_dims, num_metrics):
    H = hidden_dims[0]
    F1 = hidden_dims[1]
    ks = jax.random.split(key, 12)
    u = lambda k, shape, bound: jax.random.uniform(k, shape, jnp.float32, -bound, bound)
    kH = 1.0 / jnp.sqrt(H)

    params = {
        # LSTM layer 0 (weights stored transposed: x @ W^T), PyTorch gate order i,f,g,o
        "wih0": u(ks[0], (input_dim, 4 * H), kH),
        "whh0": u(ks[1], (H, 4 * H), kH),
        "b0":   u(ks[2], (1, 4 * H), kH) + u(ks[3], (1, 4 * H), kH),   # b_ih + b_hh
        # LSTM layer 1
        "wih1": u(ks[4], (H, 4 * H), kH),
        "whh1": u(ks[5], (H, 4 * H), kH),
        "b1":   u(ks[6], (1, 4 * H), kH) + u(ks[7], (1, 4 * H), kH),
        # FC: Linear(H, F1)
        "fcw1": u(ks[8], (H, F1), 1.0 / jnp.sqrt(H)),
        "fcb1": u(ks[9], (1, F1), 1.0 / jnp.sqrt(H)),
        # BatchNorm1d(F1), eval mode with fresh running stats
        "bn_g": jnp.ones((1, F1), jnp.float32),
        "bn_b": jnp.zeros((1, F1), jnp.float32),
        "bn_m": jnp.zeros((1, F1), jnp.float32),
        "bn_v": jnp.ones((1, F1), jnp.float32),
        # Final Linear(F1, num_metrics)
        "fcw2": u(ks[10], (F1, num_metrics), 1.0 / jnp.sqrt(F1)),
        "fcb2": u(ks[11], (1, num_metrics), 1.0 / jnp.sqrt(F1)),
    }
    return params


# Pure-JAX f32 reference (same eval-mode semantics) for a correctness check.
def reference(x, params, num_metrics=3):
    B, T, D = x.shape
    H = params["whh0"].shape[0]

    def cell(xt, h, c, wih, whh, b):
        g = xt @ wih + h @ whh + b
        i = jax.nn.sigmoid(g[:, :H]); f = jax.nn.sigmoid(g[:, H:2 * H])
        gg = jnp.tanh(g[:, 2 * H:3 * H]); o = jax.nn.sigmoid(g[:, 3 * H:])
        c = f * c + i * gg
        return o * jnp.tanh(c), c

    h1 = c1 = h2 = c2 = jnp.zeros((B, H), jnp.float32)
    for t in range(T):
        h1, c1 = cell(x[:, t, :], h1, c1, params["wih0"], params["whh0"], params["b0"])
        h2, c2 = cell(h1, h2, c2, params["wih1"], params["whh1"], params["b1"])
    l1 = jnp.maximum(h2 @ params["fcw1"] + params["fcb1"], 0.0)
    bn = (l1 - params["bn_m"]) / jnp.sqrt(params["bn_v"] + 1e-5) * params["bn_g"] + params["bn_b"]
    out = bn @ params["fcw2"] + params["fcb2"]
    return out, (jnp.stack([h1, h2]), jnp.stack([c1, c2]))


if __name__ == "__main__":
    B, T, D = 8, 8, 16
    hidden_dims = [32, 16]
    num_metrics = 3

    key = jax.random.PRNGKey(0)
    kx, kp = jax.random.split(key)
    x = jax.random.normal(kx, (B, T, D), jnp.float32)
    params = make_params(kp, D, hidden_dims, num_metrics)

    stab, (h_n, c_n) = stability_predictor(x, params, num_metrics)
    jax.block_until_ready((stab, h_n, c_n))

    ref_stab, (ref_h, ref_c) = reference(x, params, num_metrics)
    assert stab.shape == (B, num_metrics)
    assert h_n.shape == (2, B, hidden_dims[0]) and c_n.shape == (2, B, hidden_dims[0])
    # bf16 MXU operands (f32 accumulation): tolerance loosened vs the f32 kernel.
    assert jnp.allclose(stab, ref_stab, atol=3e-2, rtol=3e-2)
    assert jnp.allclose(h_n, ref_h, atol=3e-2, rtol=3e-2)
    assert jnp.allclose(c_n, ref_c, atol=3e-2, rtol=3e-2)

    print("KERNEL_OK")
</pallas_src>

<mosaic_0001>
module attributes {stable_mosaic.version = 11 : i64} {
  func.func @stability_kernel(%arg0: memref<64x128xf32, #tpu.memory_space<vmem>>, %arg1: memref<32x128xbf16, #tpu.memory_space<vmem>>, %arg2: memref<32x128xbf16, #tpu.memory_space<vmem>>, %arg3: memref<32x128xbf16, #tpu.memory_space<vmem>>, %arg4: memref<1x128xf32, #tpu.memory_space<vmem>>, %arg5: memref<32x16xbf16, #tpu.memory_space<vmem>>, %arg6: memref<1x16xf32, #tpu.memory_space<vmem>>, %arg7: memref<16x128xbf16, #tpu.memory_space<vmem>>, %arg8: memref<1x128xf32, #tpu.memory_space<vmem>>, %arg9: memref<8x128xf32, #tpu.memory_space<vmem>>, %arg10: memref<8x128xf32, #tpu.memory_space<vmem>>) attributes {dimension_semantics = [], scalar_prefetch = 0 : i64, scratch_operands = 0 : i64, tpu.core_type = #tpu.core_type<tc>} {
    %c0 = arith.constant 0 : index
    %c0_0 = arith.constant 0 : index
    %0 = vector.load %arg1[%c0, %c0_0] : memref<32x128xbf16, #tpu.memory_space<vmem>>, vector<32x128xbf16>
    %c0_1 = arith.constant 0 : index
    %c0_2 = arith.constant 0 : index
    %1 = vector.load %arg2[%c0_1, %c0_2] : memref<32x128xbf16, #tpu.memory_space<vmem>>, vector<32x128xbf16>
    %c0_3 = arith.constant 0 : index
    %c0_4 = arith.constant 0 : index
    %2 = vector.load %arg3[%c0_3, %c0_4] : memref<32x128xbf16, #tpu.memory_space<vmem>>, vector<32x128xbf16>
    %c0_5 = arith.constant 0 : index
    %c0_6 = arith.constant 0 : index
    %3 = vector.load %arg4[%c0_5, %c0_6] : memref<1x128xf32, #tpu.memory_space<vmem>>, vector<1x128xf32>
    %4 = vector.shape_cast %3 : vector<1x128xf32> to vector<1x128xf32>
    %5 = vector.broadcast %4 : vector<1x128xf32> to vector<8x128xf32>
    %6 = tpu.iota {dimensions = array<i32: 1>} : vector<8x128xi32>
    %c64_i32 = arith.constant 64 : i32
    %7 = vector.broadcast %c64_i32 : i32 to vector<8x128xi32>
    %8 = arith.cmpi sge, %6, %7 : vector<8x128xi32>
    %c96_i32 = arith.constant 96 : i32
    %9 = vector.broadcast %c96_i32 : i32 to vector<8x128xi32>
    %10 = arith.cmpi slt, %6, %9 : vector<8x128xi32>
    %11 = arith.andi %8, %10 : vector<8x128xi1>
    %cst = arith.constant 0.000000e+00 : f32
    %12 = vector.broadcast %cst : f32 to vector<8x32xf32>
    %c0_7 = arith.constant 0 : index
    %c0_8 = arith.constant 0 : index
    %13 = vector.load %arg0[%c0_7, %c0_8] : memref<64x128xf32, #tpu.memory_space<vmem>>, vector<8x128xf32>
    %14 = arith.truncf %12 : vector<8x32xf32> to vector<8x32xbf16>
    %cst_9 = arith.constant dense<0.000000e+00> : vector<8x128xf32>
    %15 = tpu.matmul %14, %0, %cst_9 {dimension_numbers = #tpu.dot_dimension_numbers<[1], [0], [0], [1], [0, 0, 1, 1], [], []>} : vector<8x32xbf16>, vector<32x128xbf16>, vector<8x128xf32> -> vector<8x128xf32>
    %16 = arith.addf %13, %15 : vector<8x128xf32>
    %17 = math.tanh %16 : vector<8x128xf32>
    %cst_10 = arith.constant 1.000000e+00 : f32
    %18 = vector.broadcast %cst_10 : f32 to vector<8x128xf32>
    %19 = arith.addf %17, %18 : vector<8x128xf32>
    %cst_11 = arith.constant 5.000000e-01 : f32
    %20 = vector.broadcast %cst_11 : f32 to vector<8x128xf32>
    %21 = arith.mulf %20, %19 : vector<8x128xf32>
    %22 = arith.select %11, %17, %21 : vector<8x128xi1>, vector<8x128xf32>
    %23 = vector.extract_strided_slice %22 {offsets = [0, 0], sizes = [8, 32], strides = [1, 1]} : vector<8x128xf32> to vector<8x32xf32>
    %24 = vector.extract_strided_slice %22 {offsets = [0, 32], sizes = [8, 32], strides = [1, 1]} : vector<8x128xf32> to vector<8x32xf32>
    %25 = vector.extract_strided_slice %22 {offsets = [0, 64], sizes = [8, 32], strides = [1, 1]} : vector<8x128xf32> to vector<8x32xf32>
    %26 = vector.extract_strided_slice %22 {offsets = [0, 96], sizes = [8, 32], strides = [1, 1]} : vector<8x128xf32> to vector<8x32xf32>
    %27 = arith.mulf %24, %12 : vector<8x32xf32>
    %28 = arith.mulf %23, %25 : vector<8x32xf32>
    %29 = arith.addf %27, %28 : vector<8x32xf32>
    %30 = math.tanh %29 : vector<8x32xf32>
    %31 = arith.mulf %26, %30 : vector<8x32xf32>
    %32 = arith.truncf %31 : vector<8x32xf32> to vector<8x32xbf16>
    %cst_12 = arith.constant dense<0.000000e+00> : vector<8x128xf32>
    %33 = tpu.matmul %32, %1, %cst_12 {dimension_numbers = #tpu.dot_dimension_numbers<[1], [0], [0], [1], [0, 0, 1, 1], [], []>} : vector<8x32xbf16>, vector<32x128xbf16>, vector<8x128xf32> -> vector<8x128xf32>
    %34 = arith.truncf %12 : vector<8x32xf32> to vector<8x32xbf16>
    %cst_13 = arith.constant dense<0.000000e+00> : vector<8x128xf32>
    %35 = tpu.matmul %34, %2, %cst_13 {dimension_numbers = #tpu.dot_dimension_numbers<[1], [0], [0], [1], [0, 0, 1, 1], [], []>} : vector<8x32xbf16>, vector<32x128xbf16>, vector<8x128xf32> -> vector<8x128xf32>
    %36 = arith.addf %33, %35 : vector<8x128xf32>
    %37 = arith.addf %36, %5 : vector<8x128xf32>
    %38 = math.tanh %37 : vector<8x128xf32>
    %cst_14 = arith.constant 1.000000e+00 : f32
    %39 = vector.broadcast %cst_14 : f32 to vector<8x128xf32>
    %40 = arith.addf %38, %39 : vector<8x128xf32>
    %cst_15 = arith.constant 5.000000e-01 : f32
    %41 = vector.broadcast %cst_15 : f32 to vector<8x128xf32>
    %42 = arith.mulf %41, %40 : vector<8x128xf32>
    %43 = arith.select %11, %38, %42 : vector<8x128xi1>, vector<8x128xf32>
    %44 = vector.extract_strided_slice %43 {offsets = [0, 0], sizes = [8, 32], strides = [1, 1]} : vector<8x128xf32> to vector<8x32xf32>
    %45 = vector.extract_strided_slice %43 {offsets = [0, 32], sizes = [8, 32], strides = [1, 1]} : vector<8x128xf32> to vector<8x32xf32>
    %46 = vector.extract_strided_slice %43 {offsets = [0, 64], sizes = [8, 32], strides = [1, 1]} : vector<8x128xf32> to vector<8x32xf32>
    %47 = vector.extract_strided_slice %43 {offsets = [0, 96], sizes = [8, 32], strides = [1, 1]} : vector<8x128xf32> to vector<8x32xf32>
    %48 = arith.mulf %45, %12 : vector<8x32xf32>
    %49 = arith.mulf %44, %46 : vector<8x32xf32>
    %50 = arith.addf %48, %49 : vector<8x32xf32>
    %51 = math.tanh %50 : vector<8x32xf32>
    %52 = arith.mulf %47, %51 : vector<8x32xf32>
    %c8 = arith.constant 8 : index
    %c0_16 = arith.constant 0 : index
    %53 = vector.load %arg0[%c8, %c0_16] : memref<64x128xf32, #tpu.memory_space<vmem>>, vector<8x128xf32>
    %54 = arith.truncf %31 : vector<8x32xf32> to vector<8x32xbf16>
    %cst_17 = arith.constant dense<0.000000e+00> : vector<8x128xf32>
    %55 = tpu.matmul %54, %0, %cst_17 {dimension_numbers = #tpu.dot_dimension_numbers<[1], [0], [0], [1], [0, 0, 1, 1], [], []>} : vector<8x32xbf16>, vector<32x128xbf16>, vector<8x128xf32> -> vector<8x128xf32>
    %56 = arith.addf %53, %55 : vector<8x128xf32>
    %57 = math.tanh %56 : vector<8x128xf32>
    %cst_18 = arith.constant 1.000000e+00 : f32
    %58 = vector.broadcast %cst_18 : f32 to vector<8x128xf32>
    %59 = arith.addf %57, %58 : vector<8x128xf32>
    %cst_19 = arith.constant 5.000000e-01 : f32
    %60 = vector.broadcast %cst_19 : f32 to vector<8x128xf32>
    %61 = arith.mulf %60, %59 : vector<8x128xf32>
    %62 = arith.select %11, %57, %61 : vector<8x128xi1>, vector<8x128xf32>
    %63 = vector.extract_strided_slice %62 {offsets = [0, 0], sizes = [8, 32], strides = [1, 1]} : vector<8x128xf32> to vector<8x32xf32>
    %64 = vector.extract_strided_slice %62 {offsets = [0, 32], sizes = [8, 32], strides = [1, 1]} : vector<8x128xf32> to vector<8x32xf32>
    %65 = vector.extract_strided_slice %62 {offsets = [0, 64], sizes = [8, 32], strides = [1, 1]} : vector<8x128xf32> to vector<8x32xf32>
    %66 = vector.extract_strided_slice %62 {offsets = [0, 96], sizes = [8, 32], strides = [1, 1]} : vector<8x128xf32> to vector<8x32xf32>
    %67 = arith.mulf %64, %29 : vector<8x32xf32>
    %68 = arith.mulf %63, %65 : vector<8x32xf32>
    %69 = arith.addf %67, %68 : vector<8x32xf32>
    %70 = math.tanh %69 : vector<8x32xf32>
    %71 = arith.mulf %66, %70 : vector<8x32xf32>
    %72 = arith.truncf %71 : vector<8x32xf32> to vector<8x32xbf16>
    %cst_20 = arith.constant dense<0.000000e+00> : vector<8x128xf32>
    %73 = tpu.matmul %72, %1, %cst_20 {dimension_numbers = #tpu.dot_dimension_numbers<[1], [0], [0], [1], [0, 0, 1, 1], [], []>} : vector<8x32xbf16>, vector<32x128xbf16>, vector<8x128xf32> -> vector<8x128xf32>
    %74 = arith.truncf %52 : vector<8x32xf32> to vector<8x32xbf16>
    %cst_21 = arith.constant dense<0.000000e+00> : vector<8x128xf32>
    %75 = tpu.matmul %74, %2, %cst_21 {dimension_numbers = #tpu.dot_dimension_numbers<[1], [0], [0], [1], [0, 0, 1, 1], [], []>} : vector<8x32xbf16>, vector<32x128xbf16>, vector<8x128xf32> -> vector<8x128xf32>
    %76 = arith.addf %73, %75 : vector<8x128xf32>
    %77 = arith.addf %76, %5 : vector<8x128xf32>
    %78 = math.tanh %77 : vector<8x128xf32>
    %cst_22 = arith.constant 1.000000e+00 : f32
    %79 = vector.broadcast %cst_22 : f32 to vector<8x128xf32>
    %80 = arith.addf %78, %79 : vector<8x128xf32>
    %cst_23 = arith.constant 5.000000e-01 : f32
    %81 = vector.broadcast %cst_23 : f32 to vector<8x128xf32>
    %82 = arith.mulf %81, %80 : vector<8x128xf32>
    %83 = arith.select %11, %78, %82 : vector<8x128xi1>, vector<8x128xf32>
    %84 = vector.extract_strided_slice %83 {offsets = [0, 0], sizes = [8, 32], strides = [1, 1]} : vector<8x128xf32> to vector<8x32xf32>
    %85 = vector.extract_strided_slice %83 {offsets = [0, 32], sizes = [8, 32], strides = [1, 1]} : vector<8x128xf32> to vector<8x32xf32>
    %86 = vector.extract_strided_slice %83 {offsets = [0, 64], sizes = [8, 32], strides = [1, 1]} : vector<8x128xf32> to vector<8x32xf32>
    %87 = vector.extract_strided_slice %83 {offsets = [0, 96], sizes = [8, 32], strides = [1, 1]} : vector<8x128xf32> to vector<8x32xf32>
    %88 = arith.mulf %85, %50 : vector<8x32xf32>
    %89 = arith.mulf %84, %86 : vector<8x32xf32>
    %90 = arith.addf %88, %89 : vector<8x32xf32>
    %91 = math.tanh %90 : vector<8x32xf32>
    %92 = arith.mulf %87, %91 : vector<8x32xf32>
    %c16 = arith.constant 16 : index
    %c0_24 = arith.constant 0 : index
    %93 = vector.load %arg0[%c16, %c0_24] : memref<64x128xf32, #tpu.memory_space<vmem>>, vector<8x128xf32>
    %94 = arith.truncf %71 : vector<8x32xf32> to vector<8x32xbf16>
    %cst_25 = arith.constant dense<0.000000e+00> : vector<8x128xf32>
    %95 = tpu.matmul %94, %0, %cst_25 {dimension_numbers = #tpu.dot_dimension_numbers<[1], [0], [0], [1], [0, 0, 1, 1], [], []>} : vector<8x32xbf16>, vector<32x128xbf16>, vector<8x128xf32> -> vector<8x128xf32>
    %96 = arith.addf %93, %95 : vector<8x128xf32>
    %97 = math.tanh %96 : vector<8x128xf32>
    %cst_26 = arith.constant 1.000000e+00 : f32
    %98 = vector.broadcast %cst_26 : f32 to vector<8x128xf32>
    %99 = arith.addf %97, %98 : vector<8x128xf32>
    %cst_27 = arith.constant 5.000000e-01 : f32
    %100 = vector.broadcast %cst_27 : f32 to vector<8x128xf32>
    %101 = arith.mulf %100, %99 : vector<8x128xf32>
    %102 = arith.select %11, %97, %101 : vector<8x128xi1>, vector<8x128xf32>
    %103 = vector.extract_strided_slice %102 {offsets = [0, 0], sizes = [8, 32], strides = [1, 1]} : vector<8x128xf32> to vector<8x32xf32>
    %104 = vector.extract_strided_slice %102 {offsets = [0, 32], sizes = [8, 32], strides = [1, 1]} : vector<8x128xf32> to vector<8x32xf32>
    %105 = vector.extract_strided_slice %102 {offsets = [0, 64], sizes = [8, 32], strides = [1, 1]} : vector<8x128xf32> to vector<8x32xf32>
    %106 = vector.extract_strided_slice %102 {offsets = [0, 96], sizes = [8, 32], strides = [1, 1]} : vector<8x128xf32> to vector<8x32xf32>
    %107 = arith.mulf %104, %69 : vector<8x32xf32>
    %108 = arith.mulf %103, %105 : vector<8x32xf32>
    %109 = arith.addf %107, %108 : vector<8x32xf32>
    %110 = math.tanh %109 : vector<8x32xf32>
    %111 = arith.mulf %106, %110 : vector<8x32xf32>
    %112 = arith.truncf %111 : vector<8x32xf32> to vector<8x32xbf16>
    %cst_28 = arith.constant dense<0.000000e+00> : vector<8x128xf32>
    %113 = tpu.matmul %112, %1, %cst_28 {dimension_numbers = #tpu.dot_dimension_numbers<[1], [0], [0], [1], [0, 0, 1, 1], [], []>} : vector<8x32xbf16>, vector<32x128xbf16>, vector<8x128xf32> -> vector<8x128xf32>
    %114 = arith.truncf %92 : vector<8x32xf32> to vector<8x32xbf16>
    %cst_29 = arith.constant dense<0.000000e+00> : vector<8x128xf32>
    %115 = tpu.matmul %114, %2, %cst_29 {dimension_numbers = #tpu.dot_dimension_numbers<[1], [0], [0], [1], [0, 0, 1, 1], [], []>} : vector<8x32xbf16>, vector<32x128xbf16>, vector<8x128xf32> -> vector<8x128xf32>
    %116 = arith.addf %113, %115 : vector<8x128xf32>
    %117 = arith.addf %116, %5 : vector<8x128xf32>
    %118 = math.tanh %117 : vector<8x128xf32>
    %cst_30 = arith.constant 1.000000e+00 : f32
    %119 = vector.broadcast %cst_30 : f32 to vector<8x128xf32>
    %120 = arith.addf %118, %119 : vector<8x128xf32>
    %cst_31 = arith.constant 5.000000e-01 : f32
    %121 = vector.broadcast %cst_31 : f32 to vector<8x128xf32>
    %122 = arith.mulf %121, %120 : vector<8x128xf32>
    %123 = arith.select %11, %118, %122 : vector<8x128xi1>, vector<8x128xf32>
    %124 = vector.extract_strided_slice %123 {offsets = [0, 0], sizes = [8, 32], strides = [1, 1]} : vector<8x128xf32> to vector<8x32xf32>
    %125 = vector.extract_strided_slice %123 {offsets = [0, 32], sizes = [8, 32], strides = [1, 1]} : vector<8x128xf32> to vector<8x32xf32>
    %126 = vector.extract_strided_slice %123 {offsets = [0, 64], sizes = [8, 32], strides = [1, 1]} : vector<8x128xf32> to vector<8x32xf32>
    %127 = vector.extract_strided_slice %123 {offsets = [0, 96], sizes = [8, 32], strides = [1, 1]} : vector<8x128xf32> to vector<8x32xf32>
    %128 = arith.mulf %125, %90 : vector<8x32xf32>
    %129 = arith.mulf %124, %126 : vector<8x32xf32>
    %130 = arith.addf %128, %129 : vector<8x32xf32>
    %131 = math.tanh %130 : vector<8x32xf32>
    %132 = arith.mulf %127, %131 : vector<8x32xf32>
    %c24 = arith.constant 24 : index
    %c0_32 = arith.constant 0 : index
    %133 = vector.load %arg0[%c24, %c0_32] : memref<64x128xf32, #tpu.memory_space<vmem>>, vector<8x128xf32>
    %134 = arith.truncf %111 : vector<8x32xf32> to vector<8x32xbf16>
    %cst_33 = arith.constant dense<0.000000e+00> : vector<8x128xf32>
    %135 = tpu.matmul %134, %0, %cst_33 {dimension_numbers = #tpu.dot_dimension_numbers<[1], [0], [0], [1], [0, 0, 1, 1], [], []>} : vector<8x32xbf16>, vector<32x128xbf16>, vector<8x128xf32> -> vector<8x128xf32>
    %136 = arith.addf %133, %135 : vector<8x128xf32>
    %137 = math.tanh %136 : vector<8x128xf32>
    %cst_34 = arith.constant 1.000000e+00 : f32
    %138 = vector.broadcast %cst_34 : f32 to vector<8x128xf32>
    %139 = arith.addf %137, %138 : vector<8x128xf32>
    %cst_35 = arith.constant 5.000000e-01 : f32
    %140 = vector.broadcast %cst_35 : f32 to vector<8x128xf32>
    %141 = arith.mulf %140, %139 : vector<8x128xf32>
    %142 = arith.select %11, %137, %141 : vector<8x128xi1>, vector<8x128xf32>
    %143 = vector.extract_strided_slice %142 {offsets = [0, 0], sizes = [8, 32], strides = [1, 1]} : vector<8x128xf32> to vector<8x32xf32>
    %144 = vector.extract_strided_slice %142 {offsets = [0, 32], sizes = [8, 32], strides = [1, 1]} : vector<8x128xf32> to vector<8x32xf32>
    %145 = vector.extract_strided_slice %142 {offsets = [0, 64], sizes = [8, 32], strides = [1, 1]} : vector<8x128xf32> to vector<8x32xf32>
    %146 = vector.extract_strided_slice %142 {offsets = [0, 96], sizes = [8, 32], strides = [1, 1]} : vector<8x128xf32> to vector<8x32xf32>
    %147 = arith.mulf %144, %109 : vector<8x32xf32>
    %148 = arith.mulf %143, %145 : vector<8x32xf32>
    %149 = arith.addf %147, %148 : vector<8x32xf32>
    %150 = math.tanh %149 : vector<8x32xf32>
    %151 = arith.mulf %146, %150 : vector<8x32xf32>
    %152 = arith.truncf %151 : vector<8x32xf32> to vector<8x32xbf16>
    %cst_36 = arith.constant dense<0.000000e+00> : vector<8x128xf32>
    %153 = tpu.matmul %152, %1, %cst_36 {dimension_numbers = #tpu.dot_dimension_numbers<[1], [0], [0], [1], [0, 0, 1, 1], [], []>} : vector<8x32xbf16>, vector<32x128xbf16>, vector<8x128xf32> -> vector<8x128xf32>
    %154 = arith.truncf %132 : vector<8x32xf32> to vector<8x32xbf16>
    %cst_37 = arith.constant dense<0.000000e+00> : vector<8x128xf32>
    %155 = tpu.matmul %154, %2, %cst_37 {dimension_numbers = #tpu.dot_dimension_numbers<[1], [0], [0], [1], [0, 0, 1, 1], [], []>} : vector<8x32xbf16>, vector<32x128xbf16>, vector<8x128xf32> -> vector<8x128xf32>
    %156 = arith.addf %153, %155 : vector<8x128xf32>
    %157 = arith.addf %156, %5 : vector<8x128xf32>
    %158 = math.tanh %157 : vector<8x128xf32>
    %cst_38 = arith.constant 1.000000e+00 : f32
    %159 = vector.broadcast %cst_38 : f32 to vector<8x128xf32>
    %160 = arith.addf %158, %159 : vector<8x128xf32>
    %cst_39 = arith.constant 5.000000e-01 : f32
    %161 = vector.broadcast %cst_39 : f32 to vector<8x128xf32>
    %162 = arith.mulf %161, %160 : vector<8x128xf32>
    %163 = arith.select %11, %158, %162 : vector<8x128xi1>, vector<8x128xf32>
    %164 = vector.extract_strided_slice %163 {offsets = [0, 0], sizes = [8, 32], strides = [1, 1]} : vector<8x128xf32> to vector<8x32xf32>
    %165 = vector.extract_strided_slice %163 {offsets = [0, 32], sizes = [8, 32], strides = [1, 1]} : vector<8x128xf32> to vector<8x32xf32>
    %166 = vector.extract_strided_slice %163 {offsets = [0, 64], sizes = [8, 32], strides = [1, 1]} : vector<8x128xf32> to vector<8x32xf32>
    %167 = vector.extract_strided_slice %163 {offsets = [0, 96], sizes = [8, 32], strides = [1, 1]} : vector<8x128xf32> to vector<8x32xf32>
    %168 = arith.mulf %165, %130 : vector<8x32xf32>
    %169 = arith.mulf %164, %166 : vector<8x32xf32>
    %170 = arith.addf %168, %169 : vector<8x32xf32>
    %171 = math.tanh %170 : vector<8x32xf32>
    %172 = arith.mulf %167, %171 : vector<8x32xf32>
    %c32 = arith.constant 32 : index
    %c0_40 = arith.constant 0 : index
    %173 = vector.load %arg0[%c32, %c0_40] : memref<64x128xf32, #tpu.memory_space<vmem>>, vector<8x128xf32>
    %174 = arith.truncf %151 : vector<8x32xf32> to vector<8x32xbf16>
    %cst_41 = arith.constant dense<0.000000e+00> : vector<8x128xf32>
    %175 = tpu.matmul %174, %0, %cst_41 {dimension_numbers = #tpu.dot_dimension_numbers<[1], [0], [0], [1], [0, 0, 1, 1], [], []>} : vector<8x32xbf16>, vector<32x128xbf16>, vector<8x128xf32> -> vector<8x128xf32>
    %176 = arith.addf %173, %175 : vector<8x128xf32>
    %177 = math.tanh %176 : vector<8x128xf32>
    %cst_42 = arith.constant 1.000000e+00 : f32
    %178 = vector.broadcast %cst_42 : f32 to vector<8x128xf32>
    %179 = arith.addf %177, %178 : vector<8x128xf32>
    %cst_43 = arith.constant 5.000000e-01 : f32
    %180 = vector.broadcast %cst_43 : f32 to vector<8x128xf32>
    %181 = arith.mulf %180, %179 : vector<8x128xf32>
    %182 = arith.select %11, %177, %181 : vector<8x128xi1>, vector<8x128xf32>
    %183 = vector.extract_strided_slice %182 {offsets = [0, 0], sizes = [8, 32], strides = [1, 1]} : vector<8x128xf32> to vector<8x32xf32>
    %184 = vector.extract_strided_slice %182 {offsets = [0, 32], sizes = [8, 32], strides = [1, 1]} : vector<8x128xf32> to vector<8x32xf32>
    %185 = vector.extract_strided_slice %182 {offsets = [0, 64], sizes = [8, 32], strides = [1, 1]} : vector<8x128xf32> to vector<8x32xf32>
    %186 = vector.extract_strided_slice %182 {offsets = [0, 96], sizes = [8, 32], strides = [1, 1]} : vector<8x128xf32> to vector<8x32xf32>
    %187 = arith.mulf %184, %149 : vector<8x32xf32>
    %188 = arith.mulf %183, %185 : vector<8x32xf32>
    %189 = arith.addf %187, %188 : vector<8x32xf32>
    %190 = math.tanh %189 : vector<8x32xf32>
    %191 = arith.mulf %186, %190 : vector<8x32xf32>
    %192 = arith.truncf %191 : vector<8x32xf32> to vector<8x32xbf16>
    %cst_44 = arith.constant dense<0.000000e+00> : vector<8x128xf32>
    %193 = tpu.matmul %192, %1, %cst_44 {dimension_numbers = #tpu.dot_dimension_numbers<[1], [0], [0], [1], [0, 0, 1, 1], [], []>} : vector<8x32xbf16>, vector<32x128xbf16>, vector<8x128xf32> -> vector<8x128xf32>
    %194 = arith.truncf %172 : vector<8x32xf32> to vector<8x32xbf16>
    %cst_45 = arith.constant dense<0.000000e+00> : vector<8x128xf32>
    %195 = tpu.matmul %194, %2, %cst_45 {dimension_numbers = #tpu.dot_dimension_numbers<[1], [0], [0], [1], [0, 0, 1, 1], [], []>} : vector<8x32xbf16>, vector<32x128xbf16>, vector<8x128xf32> -> vector<8x128xf32>
    %196 = arith.addf %193, %195 : vector<8x128xf32>
    %197 = arith.addf %196, %5 : vector<8x128xf32>
    %198 = math.tanh %197 : vector<8x128xf32>
    %cst_46 = arith.constant 1.000000e+00 : f32
    %199 = vector.broadcast %cst_46 : f32 to vector<8x128xf32>
    %200 = arith.addf %198, %199 : vector<8x128xf32>
    %cst_47 = arith.constant 5.000000e-01 : f32
    %201 = vector.broadcast %cst_47 : f32 to vector<8x128xf32>
    %202 = arith.mulf %201, %200 : vector<8x128xf32>
    %203 = arith.select %11, %198, %202 : vector<8x128xi1>, vector<8x128xf32>
    %204 = vector.extract_strided_slice %203 {offsets = [0, 0], sizes = [8, 32], strides = [1, 1]} : vector<8x128xf32> to vector<8x32xf32>
    %205 = vector.extract_strided_slice %203 {offsets = [0, 32], sizes = [8, 32], strides = [1, 1]} : vector<8x128xf32> to vector<8x32xf32>
    %206 = vector.extract_strided_slice %203 {offsets = [0, 64], sizes = [8, 32], strides = [1, 1]} : vector<8x128xf32> to vector<8x32xf32>
    %207 = vector.extract_strided_slice %203 {offsets = [0, 96], sizes = [8, 32], strides = [1, 1]} : vector<8x128xf32> to vector<8x32xf32>
    %208 = arith.mulf %205, %170 : vector<8x32xf32>
    %209 = arith.mulf %204, %206 : vector<8x32xf32>
    %210 = arith.addf %208, %209 : vector<8x32xf32>
    %211 = math.tanh %210 : vector<8x32xf32>
    %212 = arith.mulf %207, %211 : vector<8x32xf32>
    %c40 = arith.constant 40 : index
    %c0_48 = arith.constant 0 : index
    %213 = vector.load %arg0[%c40, %c0_48] : memref<64x128xf32, #tpu.memory_space<vmem>>, vector<8x128xf32>
    %214 = arith.truncf %191 : vector<8x32xf32> to vector<8x32xbf16>
    %cst_49 = arith.constant dense<0.000000e+00> : vector<8x128xf32>
    %215 = tpu.matmul %214, %0, %cst_49 {dimension_numbers = #tpu.dot_dimension_numbers<[1], [0], [0], [1], [0, 0, 1, 1], [], []>} : vector<8x32xbf16>, vector<32x128xbf16>, vector<8x128xf32> -> vector<8x128xf32>
    %216 = arith.addf %213, %215 : vector<8x128xf32>
    %217 = math.tanh %216 : vector<8x128xf32>
    %cst_50 = arith.constant 1.000000e+00 : f32
    %218 = vector.broadcast %cst_50 : f32 to vector<8x128xf32>
    %219 = arith.addf %217, %218 : vector<8x128xf32>
    %cst_51 = arith.constant 5.000000e-01 : f32
    %220 = vector.broadcast %cst_51 : f32 to vector<8x128xf32>
    %221 = arith.mulf %220, %219 : vector<8x128xf32>
    %222 = arith.select %11, %217, %221 : vector<8x128xi1>, vector<8x128xf32>
    %223 = vector.extract_strided_slice %222 {offsets = [0, 0], sizes = [8, 32], strides = [1, 1]} : vector<8x128xf32> to vector<8x32xf32>
    %224 = vector.extract_strided_slice %222 {offsets = [0, 32], sizes = [8, 32], strides = [1, 1]} : vector<8x128xf32> to vector<8x32xf32>
    %225 = vector.extract_strided_slice %222 {offsets = [0, 64], sizes = [8, 32], strides = [1, 1]} : vector<8x128xf32> to vector<8x32xf32>
    %226 = vector.extract_strided_slice %222 {offsets = [0, 96], sizes = [8, 32], strides = [1, 1]} : vector<8x128xf32> to vector<8x32xf32>
    %227 = arith.mulf %224, %189 : vector<8x32xf32>
    %228 = arith.mulf %223, %225 : vector<8x32xf32>
    %229 = arith.addf %227, %228 : vector<8x32xf32>
    %230 = math.tanh %229 : vector<8x32xf32>
    %231 = arith.mulf %226, %230 : vector<8x32xf32>
    %232 = arith.truncf %231 : vector<8x32xf32> to vector<8x32xbf16>
    %cst_52 = arith.constant dense<0.000000e+00> : vector<8x128xf32>
    %233 = tpu.matmul %232, %1, %cst_52 {dimension_numbers = #tpu.dot_dimension_numbers<[1], [0], [0], [1], [0, 0, 1, 1], [], []>} : vector<8x32xbf16>, vector<32x128xbf16>, vector<8x128xf32> -> vector<8x128xf32>
    %234 = arith.truncf %212 : vector<8x32xf32> to vector<8x32xbf16>
    %cst_53 = arith.constant dense<0.000000e+00> : vector<8x128xf32>
    %235 = tpu.matmul %234, %2, %cst_53 {dimension_numbers = #tpu.dot_dimension_numbers<[1], [0], [0], [1], [0, 0, 1, 1], [], []>} : vector<8x32xbf16>, vector<32x128xbf16>, vector<8x128xf32> -> vector<8x128xf32>
    %236 = arith.addf %233, %235 : vector<8x128xf32>
    %237 = arith.addf %236, %5 : vector<8x128xf32>
    %238 = math.tanh %237 : vector<8x128xf32>
    %cst_54 = arith.constant 1.000000e+00 : f32
    %239 = vector.broadcast %cst_54 : f32 to vector<8x128xf32>
    %240 = arith.addf %238, %239 : vector<8x128xf32>
    %cst_55 = arith.constant 5.000000e-01 : f32
    %241 = vector.broadcast %cst_55 : f32 to vector<8x128xf32>
    %242 = arith.mulf %241, %240 : vector<8x128xf32>
    %243 = arith.select %11, %238, %242 : vector<8x128xi1>, vector<8x128xf32>
    %244 = vector.extract_strided_slice %243 {offsets = [0, 0], sizes = [8, 32], strides = [1, 1]} : vector<8x128xf32> to vector<8x32xf32>
    %245 = vector.extract_strided_slice %243 {offsets = [0, 32], sizes = [8, 32], strides = [1, 1]} : vector<8x128xf32> to vector<8x32xf32>
    %246 = vector.extract_strided_slice %243 {offsets = [0, 64], sizes = [8, 32], strides = [1, 1]} : vector<8x128xf32> to vector<8x32xf32>
    %247 = vector.extract_strided_slice %243 {offsets = [0, 96], sizes = [8, 32], strides = [1, 1]} : vector<8x128xf32> to vector<8x32xf32>
    %248 = arith.mulf %245, %210 : vector<8x32xf32>
    %249 = arith.mulf %244, %246 : vector<8x32xf32>
    %250 = arith.addf %248, %249 : vector<8x32xf32>
    %251 = math.tanh %250 : vector<8x32xf32>
    %252 = arith.mulf %247, %251 : vector<8x32xf32>
    %c48 = arith.constant 48 : index
    %c0_56 = arith.constant 0 : index
    %253 = vector.load %arg0[%c48, %c0_56] : memref<64x128xf32, #tpu.memory_space<vmem>>, vector<8x128xf32>
    %254 = arith.truncf %231 : vector<8x32xf32> to vector<8x32xbf16>
    %cst_57 = arith.constant dense<0.000000e+00> : vector<8x128xf32>
    %255 = tpu.matmul %254, %0, %cst_57 {dimension_numbers = #tpu.dot_dimension_numbers<[1], [0], [0], [1], [0, 0, 1, 1], [], []>} : vector<8x32xbf16>, vector<32x128xbf16>, vector<8x128xf32> -> vector<8x128xf32>
    %256 = arith.addf %253, %255 : vector<8x128xf32>
    %257 = math.tanh %256 : vector<8x128xf32>
    %cst_58 = arith.constant 1.000000e+00 : f32
    %258 = vector.broadcast %cst_58 : f32 to vector<8x128xf32>
    %259 = arith.addf %257, %258 : vector<8x128xf32>
    %cst_59 = arith.constant 5.000000e-01 : f32
    %260 = vector.broadcast %cst_59 : f32 to vector<8x128xf32>
    %261 = arith.mulf %260, %259 : vector<8x128xf32>
    %262 = arith.select %11, %257, %261 : vector<8x128xi1>, vector<8x128xf32>
    %263 = vector.extract_strided_slice %262 {offsets = [0, 0], sizes = [8, 32], strides = [1, 1]} : vector<8x128xf32> to vector<8x32xf32>
    %264 = vector.extract_strided_slice %262 {offsets = [0, 32], sizes = [8, 32], strides = [1, 1]} : vector<8x128xf32> to vector<8x32xf32>
    %265 = vector.extract_strided_slice %262 {offsets = [0, 64], sizes = [8, 32], strides = [1, 1]} : vector<8x128xf32> to vector<8x32xf32>
    %266 = vector.extract_strided_slice %262 {offsets = [0, 96], sizes = [8, 32], strides = [1, 1]} : vector<8x128xf32> to vector<8x32xf32>
    %267 = arith.mulf %264, %229 : vector<8x32xf32>
    %268 = arith.mulf %263, %265 : vector<8x32xf32>
    %269 = arith.addf %267, %268 : vector<8x32xf32>
    %270 = math.tanh %269 : vector<8x32xf32>
    %271 = arith.mulf %266, %270 : vector<8x32xf32>
    %272 = arith.truncf %271 : vector<8x32xf32> to vector<8x32xbf16>
    %cst_60 = arith.constant dense<0.000000e+00> : vector<8x128xf32>
    %273 = tpu.matmul %272, %1, %cst_60 {dimension_numbers = #tpu.dot_dimension_numbers<[1], [0], [0], [1], [0, 0, 1, 1], [], []>} : vector<8x32xbf16>, vector<32x128xbf16>, vector<8x128xf32> -> vector<8x128xf32>
    %274 = arith.truncf %252 : vector<8x32xf32> to vector<8x32xbf16>
    %cst_61 = arith.constant dense<0.000000e+00> : vector<8x128xf32>
    %275 = tpu.matmul %274, %2, %cst_61 {dimension_numbers = #tpu.dot_dimension_numbers<[1], [0], [0], [1], [0, 0, 1, 1], [], []>} : vector<8x32xbf16>, vector<32x128xbf16>, vector<8x128xf32> -> vector<8x128xf32>
    %276 = arith.addf %273, %275 : vector<8x128xf32>
    %277 = arith.addf %276, %5 : vector<8x128xf32>
    %278 = math.tanh %277 : vector<8x128xf32>
    %cst_62 = arith.constant 1.000000e+00 : f32
    %279 = vector.broadcast %cst_62 : f32 to vector<8x128xf32>
    %280 = arith.addf %278, %279 : vector<8x128xf32>
    %cst_63 = arith.constant 5.000000e-01 : f32
    %281 = vector.broadcast %cst_63 : f32 to vector<8x128xf32>
    %282 = arith.mulf %281, %280 : vector<8x128xf32>
    %283 = arith.select %11, %278, %282 : vector<8x128xi1>, vector<8x128xf32>
    %284 = vector.extract_strided_slice %283 {offsets = [0, 0], sizes = [8, 32], strides = [1, 1]} : vector<8x128xf32> to vector<8x32xf32>
    %285 = vector.extract_strided_slice %283 {offsets = [0, 32], sizes = [8, 32], strides = [1, 1]} : vector<8x128xf32> to vector<8x32xf32>
    %286 = vector.extract_strided_slice %283 {offsets = [0, 64], sizes = [8, 32], strides = [1, 1]} : vector<8x128xf32> to vector<8x32xf32>
    %287 = vector.extract_strided_slice %283 {offsets = [0, 96], sizes = [8, 32], strides = [1, 1]} : vector<8x128xf32> to vector<8x32xf32>
    %288 = arith.mulf %285, %250 : vector<8x32xf32>
    %289 = arith.mulf %284, %286 : vector<8x32xf32>
    %290 = arith.addf %288, %289 : vector<8x32xf32>
    %291 = math.tanh %290 : vector<8x32xf32>
    %292 = arith.mulf %287, %291 : vector<8x32xf32>
    %c56 = arith.constant 56 : index
    %c0_64 = arith.constant 0 : index
    %293 = vector.load %arg0[%c56, %c0_64] : memref<64x128xf32, #tpu.memory_space<vmem>>, vector<8x128xf32>
    %294 = arith.truncf %271 : vector<8x32xf32> to vector<8x32xbf16>
    %cst_65 = arith.constant dense<0.000000e+00> : vector<8x128xf32>
    %295 = tpu.matmul %294, %0, %cst_65 {dimension_numbers = #tpu.dot_dimension_numbers<[1], [0], [0], [1], [0, 0, 1, 1], [], []>} : vector<8x32xbf16>, vector<32x128xbf16>, vector<8x128xf32> -> vector<8x128xf32>
    %296 = arith.addf %293, %295 : vector<8x128xf32>
    %297 = math.tanh %296 : vector<8x128xf32>
    %cst_66 = arith.constant 1.000000e+00 : f32
    %298 = vector.broadcast %cst_66 : f32 to vector<8x128xf32>
    %299 = arith.addf %297, %298 : vector<8x128xf32>
    %cst_67 = arith.constant 5.000000e-01 : f32
    %300 = vector.broadcast %cst_67 : f32 to vector<8x128xf32>
    %301 = arith.mulf %300, %299 : vector<8x128xf32>
    %302 = arith.select %11, %297, %301 : vector<8x128xi1>, vector<8x128xf32>
    %303 = vector.extract_strided_slice %302 {offsets = [0, 0], sizes = [8, 32], strides = [1, 1]} : vector<8x128xf32> to vector<8x32xf32>
    %304 = vector.extract_strided_slice %302 {offsets = [0, 32], sizes = [8, 32], strides = [1, 1]} : vector<8x128xf32> to vector<8x32xf32>
    %305 = vector.extract_strided_slice %302 {offsets = [0, 64], sizes = [8, 32], strides = [1, 1]} : vector<8x128xf32> to vector<8x32xf32>
    %306 = vector.extract_strided_slice %302 {offsets = [0, 96], sizes = [8, 32], strides = [1, 1]} : vector<8x128xf32> to vector<8x32xf32>
    %307 = arith.mulf %304, %269 : vector<8x32xf32>
    %308 = arith.mulf %303, %305 : vector<8x32xf32>
    %309 = arith.addf %307, %308 : vector<8x32xf32>
    %310 = math.tanh %309 : vector<8x32xf32>
    %311 = arith.mulf %306, %310 : vector<8x32xf32>
    %312 = arith.truncf %311 : vector<8x32xf32> to vector<8x32xbf16>
    %cst_68 = arith.constant dense<0.000000e+00> : vector<8x128xf32>
    %313 = tpu.matmul %312, %1, %cst_68 {dimension_numbers = #tpu.dot_dimension_numbers<[1], [0], [0], [1], [0, 0, 1, 1], [], []>} : vector<8x32xbf16>, vector<32x128xbf16>, vector<8x128xf32> -> vector<8x128xf32>
    %314 = arith.truncf %292 : vector<8x32xf32> to vector<8x32xbf16>
    %cst_69 = arith.constant dense<0.000000e+00> : vector<8x128xf32>
    %315 = tpu.matmul %314, %2, %cst_69 {dimension_numbers = #tpu.dot_dimension_numbers<[1], [0], [0], [1], [0, 0, 1, 1], [], []>} : vector<8x32xbf16>, vector<32x128xbf16>, vector<8x128xf32> -> vector<8x128xf32>
    %316 = arith.addf %313, %315 : vector<8x128xf32>
    %317 = arith.addf %316, %5 : vector<8x128xf32>
    %318 = math.tanh %317 : vector<8x128xf32>
    %cst_70 = arith.constant 1.000000e+00 : f32
    %319 = vector.broadcast %cst_70 : f32 to vector<8x128xf32>
    %320 = arith.addf %318, %319 : vector<8x128xf32>
    %cst_71 = arith.constant 5.000000e-01 : f32
    %321 = vector.broadcast %cst_71 : f32 to vector<8x128xf32>
    %322 = arith.mulf %321, %320 : vector<8x128xf32>
    %323 = arith.select %11, %318, %322 : vector<8x128xi1>, vector<8x128xf32>
    %324 = vector.extract_strided_slice %323 {offsets = [0, 0], sizes = [8, 32], strides = [1, 1]} : vector<8x128xf32> to vector<8x32xf32>
    %325 = vector.extract_strided_slice %323 {offsets = [0, 32], sizes = [8, 32], strides = [1, 1]} : vector<8x128xf32> to vector<8x32xf32>
    %326 = vector.extract_strided_slice %323 {offsets = [0, 64], sizes = [8, 32], strides = [1, 1]} : vector<8x128xf32> to vector<8x32xf32>
    %327 = vector.extract_strided_slice %323 {offsets = [0, 96], sizes = [8, 32], strides = [1, 1]} : vector<8x128xf32> to vector<8x32xf32>
    %328 = arith.mulf %325, %290 : vector<8x32xf32>
    %329 = arith.mulf %324, %326 : vector<8x32xf32>
    %330 = arith.addf %328, %329 : vector<8x32xf32>
    %331 = math.tanh %330 : vector<8x32xf32>
    %332 = arith.mulf %327, %331 : vector<8x32xf32>
    %333 = arith.truncf %332 : vector<8x32xf32> to vector<8x32xbf16>
    %c0_72 = arith.constant 0 : index
    %c0_73 = arith.constant 0 : index
    %334 = vector.load %arg5[%c0_72, %c0_73] : memref<32x16xbf16, #tpu.memory_space<vmem>>, vector<32x16xbf16>
    %cst_74 = arith.constant dense<0.000000e+00> : vector<8x16xf32>
    %335 = tpu.matmul %333, %334, %cst_74 {dimension_numbers = #tpu.dot_dimension_numbers<[1], [0], [0], [1], [0, 0, 1, 1], [], []>} : vector<8x32xbf16>, vector<32x16xbf16>, vector<8x16xf32> -> vector<8x16xf32>
    %c0_75 = arith.constant 0 : index
    %c0_76 = arith.constant 0 : index
    %336 = vector.load %arg6[%c0_75, %c0_76] : memref<1x16xf32, #tpu.memory_space<vmem>>, vector<1x16xf32>
    %337 = vector.broadcast %336 : vector<1x16xf32> to vector<8x16xf32>
    %338 = arith.addf %335, %337 : vector<8x16xf32>
    %cst_77 = arith.constant 0.000000e+00 : f32
    %339 = vector.broadcast %cst_77 : f32 to vector<8x16xf32>
    %340 = arith.maximumf %338, %339 : vector<8x16xf32>
    %341 = arith.truncf %340 : vector<8x16xf32> to vector<8x16xbf16>
    %c0_78 = arith.constant 0 : index
    %c0_79 = arith.constant 0 : index
    %342 = vector.load %arg7[%c0_78, %c0_79] : memref<16x128xbf16, #tpu.memory_space<vmem>>, vector<16x128xbf16>
    %cst_80 = arith.constant dense<0.000000e+00> : vector<8x128xf32>
    %343 = tpu.matmul %341, %342, %cst_80 {dimension_numbers = #tpu.dot_dimension_numbers<[1], [0], [0], [1], [0, 0, 1, 1], [], []>} : vector<8x16xbf16>, vector<16x128xbf16>, vector<8x128xf32> -> vector<8x128xf32>
    %c0_81 = arith.constant 0 : index
    %c0_82 = arith.constant 0 : index
    %344 = vector.load %arg8[%c0_81, %c0_82] : memref<1x128xf32, #tpu.memory_space<vmem>>, vector<1x128xf32>
    %345 = vector.broadcast %344 : vector<1x128xf32> to vector<8x128xf32>
    %346 = arith.addf %343, %345 : vector<8x128xf32>
    %c0_83 = arith.constant 0 : index
    %c0_84 = arith.constant 0 : index
    %347 = vector.load %arg9[%c0_83, %c0_84] : memref<8x128xf32, #tpu.memory_space<vmem>>, vector<8x128xf32>
    tpu.vector_store %arg9[%c0_83, %c0_84], %346 {strides = array<i32>} : memref<8x128xf32, #tpu.memory_space<vmem>>, vector<8x128xf32>,
    %348 = tpu.concatenate %311, %332, %309, %330 in 1 : vector<8x32xf32>, vector<8x32xf32>, vector<8x32xf32>, vector<8x32xf32> -> vector<8x128xf32>
    %c0_85 = arith.constant 0 : index
    %c0_86 = arith.constant 0 : index
    %349 = vector.load %arg10[%c0_85, %c0_86] : memref<8x128xf32, #tpu.memory_space<vmem>>, vector<8x128xf32>
    tpu.vector_store %arg10[%c0_85, %c0_86], %348 {strides = array<i32>} : memref<8x128xf32, #tpu.memory_space<vmem>>, vector<8x128xf32>,
    return
  }
}

</mosaic_0001>

<bundles_post_ra>
// kernel: tpu_custom_call.1
= control target key start
LH: loop header
LB: loop body
LE: loop exit
PB: predicated region body
PF: predicated region fallthrough
CT: control target
= control target key end

     0   :  { %16 = vsyncpa [#allocation3], 0  ;;  %s2744_s0 = inlined_call_operand.hbm [shape: f32[64,128], index: 0, kind: input, shape index: {}]   ;;  %s2745_s1 = inlined_call_operand.vmem [shape: bf16[32,128], index: 1, kind: input, shape index: {}]   ;;  %s2746_s2 = inlined_call_operand.hbm [shape: bf16[32,128], index: 2, kind: input, shape index: {}]   ;;  %s2747_s3 = inlined_call_operand.vmem [shape: bf16[32,128], index: 3, kind: input, shape index: {}]   ;;  %s2748_s4 = inlined_call_operand.vmem [shape: f32[1,128], index: 4, kind: input, shape index: {}]   ;;  %s2749_s5 = inlined_call_operand.vmem [shape: bf16[32,16], index: 5, kind: input, shape index: {}]   ;;  %s2750_s6 = inlined_call_operand.vmem [shape: f32[1,16], index: 6, kind: input, shape index: {}]   ;;  %s2751_s7 = inlined_call_operand.vmem [shape: bf16[16,128], index: 7, kind: input, shape index: {}]   ;;  %s2752_s8 = inlined_call_operand.vmem [shape: f32[1,128], index: 8, kind: input, shape index: {}]   ;;  %s2753_s9 = inlined_call_operand.hbm [shape: f32[8,128], index: 9, kind: output, shape index: {0}]   ;;  %s2754_s10 = inlined_call_operand.hbm [shape: f32[8,128], index: 10, kind: output, shape index: {1}]  }
   0x1   :  { %17 = vsyncpa [#allocation6], 0 }
   0x2   :  { %18 = vsyncpa [#allocation4], 0 }
   0x3   :  { %19 = vsyncpa [#allocation9], 0  ;;  %s2240_s13 = smov [#allocation2]   ;;  %s2144_s17 = scalar_lea.hbm %s2744_s0, 1024 }
   0x4   :  { %s25_s14 = sshll.u32 %s2240_s13, 4  ;;  %p2145_p0 = scmp.ne.s32.totalorder %s2744_s0, %s2144_s17  ;;  %s26_s14 = int_to_ptr.vmem [resolvable:$true] %s25_s14 }
   0x5   :  { %p2148_p1 = scmp.lt.u32.totalorder %s2144_s17, %s2744_s0 }
   0x7   :  { %p2150_p2 = pnand %p2148_p1, %p2145_p0 }
   0x9   :  { %2153 = shalt.err (!%p2150_p2)
}
   0xa   :  { %s2154_s22 = scalar_lea.vmem %s26_s14, 1024  ;;  %p2159_p4 = scmp.lt.s32.totalorder %s26_s14, %s26_s14 }
   0xb   :  { %p2155_p3 = scmp.ne.s32.totalorder %s26_s14, %s2154_s22  ;;  %p2160_p5 = scmp.lt.s32.totalorder %s2154_s22, %s2154_s22 }
   0xd   :  { %p2161_p6 = por %p2160_p5, %p2159_p4 }
   0xf   :  { %p2162_p7 = pnand %p2161_p6, %p2155_p3 }
  0x11   :  { %2165 = shalt.err (!%p2162_p7)
}
  0x12   :  { %s2241_s23 = smov 128   ;;  %s2242_s24 = smov 8  }
  0x13   :  { %31 = dma.hbm_to_vmem [thread:$0]  %s2744_s0, 1024, %s26_s14, [#allocation3], %s2241_s23, %s2241_s23, %s2242_s24  }
  0x14   :  { %s2243_s27 = smov [#allocation5]   ;;  %s2166_s11 = scalar_lea.hbm %s2746_s2, 256 }
  0x15   :  { %s39_s28 = sshll.u32 %s2243_s27, 4  ;;  %p2167_p8 = scmp.ne.s32.totalorder %s2746_s2, %s2166_s11  ;;  %s40_s28 = int_to_ptr.vmem [resolvable:$true] %s39_s28 }
  0x16   :  { %p2170_p9 = scmp.lt.u32.totalorder %s2166_s11, %s2746_s2 }
  0x18   :  { %p2172_p10 = pnand %p2170_p9, %p2167_p8 }
  0x1a   :  { %2175 = shalt.err (!%p2172_p10)
}
  0x1b   :  { %s2176_s17 = scalar_lea.vmem %s40_s28, 256  ;;  %p2181_p12 = scmp.lt.s32.totalorder %s40_s28, %s40_s28 }
  0x1c   :  { %p2177_p11 = scmp.ne.s32.totalorder %s40_s28, %s2176_s17  ;;  %p2182_p13 = scmp.lt.s32.totalorder %s2176_s17, %s2176_s17 }
  0x1e   :  { %p2183_p0 = por %p2182_p13, %p2181_p12 }
  0x20   :  { %p2184_p1 = pnand %p2183_p0, %p2177_p11 }
  0x22   :  { %2187 = shalt.err (!%p2184_p1)
}
  0x23   :  { %s2244_s0 = smov 64   ;;  %s2245_s14 = smov 4  }
  0x24   :  { %45 = dma.hbm_to_vmem [thread:$0]  %s2746_s2, 256, %s40_s28, [#allocation6], %s2244_s0, %s2244_s0, %s2245_s14  }
  0x25   :  { %2232 = dma.done.wait [#allocation3], 1024  }
  0x26   :  { %2233 = vsyncadd [#allocation3], 4294966272 }
  0x27   :  { %2234 = dma.done.wait [#allocation6], 256  }
  0x28   :  { %2235 = vsyncadd [#allocation6], 4294967040  ;;  %v2246_v0 = vmov 0.0   ;;  %vm2247_vm0 = vmmov 0   ;;  %v2342_v1 = vld [vmem:[%s2745_s1] sm:$0xff]   ;;  %v2348_v2 = vld [vmem:[%s2745_s1 + $0x8] sm:$0xff]   ;;  %v84_v10 = vlaneseq }
  0x29   :  { %1851 = vmatprep.subr.bf16.mxu0 %v2246_v0  ;;  %1855 = vmatprep.mubr.msk.bf16.mxu0 %vm2247_vm0, %v2246_v0  ;;  %v2248_v3 = vmov 0   ;;  %v89_v4 = vld [vmem:[#allocation2] sm:$0xff]  ;;  %s2249_s23 = smov 32   ;;  %v2377_v24 = vld [vmem:[%s2747_s3 + $0x8] sm:$0xff]   ;;  %vm102_vm4 = vcmask 261120   ;;  %vm1703_vm5 = vcmask 523264  }
  0x2a   :  { %1859 = vmatprep.subr.bf16.mxu1 %v2246_v0  ;;  %1863 = vmatprep.mubr.msk.bf16.mxu1 %vm2247_vm0, %v2246_v0  ;;  %v85_v11 = vand.u32 127, %v84_v10  ;;  %v2369_v22 = vld [vmem:[%s2747_s3] sm:$0xff]   ;;  %v2380_v25 = vld [vmem:[#allocation5 + $0x8] sm:$0xff]   ;;  %vm1705_vm6 = vcmask 785408   ;;  %vm1641_vm7 = vcmask 130048  }
  0x2b   :  { %1852 = vmatpush3.bf16.msra.mxu0 %v2342_v1  ;;  %v2371_v23 = vld [vmem:[#allocation5] sm:$0xff]   ;;  %1860 = vmatpush3.bf16.msra.mxu1 %v2369_v22  ;;  %v301_v35 = vld [vmem:[#allocation2 + $0x8] sm:$0xff] }
  0x2c   :  { %1853 = vmatprep.subr.bf16.mxu0 %v2246_v0  ;;  %vm86_vm1 = vcmp.ge.s32.totalorder %v85_v11, 64  ;;  %vm87_vm2 = vcmp.lt.s32.totalorder %v85_v11, 96  ;;  %1861 = vmatprep.subr.bf16.mxu1 %v2246_v0  ;;  %v2413_v36 = vld [vmem:[%s2748_s4] ss:$0 sm:$0xff]  ;;  %v2076_v14 = vld [vmem:[%s2749_s5 + $0x8] sm:$0xff]  }
  0x2d   :  { %vm2355_vm3 = vmand %vm86_vm1, %vm87_vm2 }
  0x2f   :  { %1854 = vmatpush3.bf16.msra.mxu0 %v2348_v2  ;;  %1862 = vmatpush3.bf16.msra.mxu1 %v2377_v24 }
  0x30   :  { %1867 = vmatprep.subr.bf16.mxu0 %v2246_v0  ;;  %1875 = vmatprep.subr.bf16.mxu1 %v2246_v0 }
  0x32   :  { %1856 = vmatmul.mubr.bf16.vlgmr.msra.gmra.mrb[0].mxu0 %v2248_v3  ;;  %1864 = vmatmul.mubr.bf16.vlgmr.msra.gmra.mrb[0].mxu1 %v2248_v3 }
  0x33   :  { %1871 = vmatprep.mubr.msk.bf16.mxu0 %vm2247_vm0, %v2246_v0  ;;  %1868 = vmatpush3.bf16.msra.mxu0 %v2371_v23 }
  0x34   :  { %1869 = vmatprep.subr.bf16.mxu0 %v2246_v0  ;;  %1876 = vmatpush3.bf16.msra.mxu1 %v2342_v1 }
  0x35   :  { %1879 = vmatprep.mubr.msk.bf16.mxu1 %vm2247_vm0, %v2246_v0  ;;  %1877 = vmatprep.subr.bf16.mxu1 %v2246_v0 }
  0x37   :  { %1870 = vmatpush3.bf16.msra.mxu0 %v2380_v25 }
  0x38   :  { %1883 = vmatprep.subr.bf16.mxu0 %v2246_v0  ;;  %1878 = vmatpush3.bf16.msra.mxu1 %v2348_v2 }
  0x39   :  { %1891 = vmatprep.subr.bf16.mxu1 %v2246_v0 }
 0x105   :  { %v140_v5 = vpop.f32.mrb[0].mxu0  ;;  %v215_v30 = vpop.f32.mrb[0].mxu1 }
 0x106   :  { %v146_v6 = vadd.f32 %v140_v5, %v89_v4  ;;  %v1857_v7 = vpop.f32.mrb[1].mxu0  ;;  %v1865_v31 = vpop.f32.mrb[1].mxu1 }
 0x107   :  { %v143_v8 = vpop.f32.mrb[2].mxu0  ;;  %v218_v32 = vpop.f32.mrb[2].mxu1 }
 0x108   :  { %2078 = vtanh.f32 %v146_v6  ;;  %v1858_v9 = vpop.f32.mrb[3].mxu0  ;;  %v1866_v33 = vpop.f32.mrb[3].mxu1 }
 0x112   :  { %v2079_v12 = vpop.eup %2078 }
 0x113   :  { %v148_v13 = vadd.f32 1.0, %v2079_v12 }
 0x115   :  { %v149_v15 = vmul.f32 0.5, %v148_v13 }
 0x117   :  { %v150_v16 = vsel %vm2355_vm3, %v2079_v12, %v149_v15 }
 0x118   :  { %153 = vrot.lane.b32.xlu0 %v150_v16, %s2244_s0  ;;  %v151_v19 = vmul.f32 0.0, %v150_v16 }
 0x18a   :  { %v154_v17 = vpop.permute.xlu0 %153 }
 0x18b   :  { %v156_v18 = vmul.f32 %v154_v17, %v150_v16 }
 0x18d   :  { %158 = vrot.lane.b32.xlu0 %v156_v18, %s2249_s23 }
 0x1ff   :  { %v159_v20 = vpop.permute.xlu0 %158 }
 0x200   :  { %v2363_v21 = vadd.f32 %v159_v20, %v151_v19 }
 0x202   :  { %2080 = vtanh.f32 %v2363_v21 }
 0x20c   :  { %v2081_v26 = vpop.eup %2080 }
 0x20d   :  { %164 = vrot.lane.b32.xlu1 %v2081_v26, %s2244_s0 }
 0x27f   :  { %v165_v27 = vpop.permute.xlu1 %164 }
 0x280   :  { %v167_v28 = vmul.f32 %v165_v27, %v150_v16 }
 0x282   :  { %v168_v29 = vpack.c.bf16 %v167_v28, %v167_v28 }
 0x284   :  { %222 = vrot.lane.b32.xlu1 %v168_v29, %s2249_s23 }
 0x2f6   :  { %v223_v34 = vpop.permute.xlu1 %222 }
 0x2f7   :  { %1872 = vmatmul.mubr.msk.bf16.vlgmr.msra.gmra.mrb[4].mxu0 %vm102_vm4, %v223_v34  ;;  %1880 = vmatmul.mubr.msk.bf16.vlgmr.msra.gmra.mrb[4].mxu1 %vm102_vm4, %v223_v34 }
 0x2f8   :  { %1892 = vmatpush3.bf16.msra.mxu1 %v2371_v23  ;;  %1884 = vmatpush3.bf16.msra.mxu0 %v2369_v22 }
 0x2f9   :  { %1893 = vmatprep.subr.bf16.mxu1 %v2246_v0  ;;  %1885 = vmatprep.subr.bf16.mxu0 %v2246_v0 }
 0x2fa   :  { %1895 = vmatprep.mubr.msk.bf16.mxu1 %vm2247_vm0, %v2246_v0  ;;  %1887 = vmatprep.mubr.msk.bf16.mxu0 %vm2247_vm0, %v2246_v0 }
 0x2fc   :  { %1894 = vmatpush3.bf16.msra.mxu1 %v2380_v25  ;;  %1886 = vmatpush3.bf16.msra.mxu0 %v2377_v24 }
 0x2fd   :  { %1899 = vmatprep.subr.bf16.mxu0 %v2246_v0  ;;  %1907 = vmatprep.subr.bf16.mxu1 %v2246_v0 }
 0x3ca   :  { %v273_v37 = vpop.f32.mrb[4].mxu0  ;;  %v336_v38 = vpop.f32.mrb[4].mxu1 }
 0x3cb   :  { %v274_v39 = vadd.f32 %v273_v37, %v215_v30  ;;  %v342_v40 = vadd.f32 %v336_v38, %v301_v35  ;;  %v1873_v41 = vpop.f32.mrb[5].mxu0  ;;  %v1881_v42 = vpop.f32.mrb[5].mxu1  ;;  %v480_v30 = vld [vmem:[#allocation2 + $0x10] sm:$0xff] }
 0x3cc   :  { %v276_v43 = vpop.f32.mrb[6].mxu0  ;;  %v339_v44 = vpop.f32.mrb[6].mxu1 }
 0x3cd   :  { %v279_v45 = vadd.f32 %v2413_v36, %v274_v39  ;;  %2082 = vtanh.f32 %v342_v40  ;;  %v1874_v46 = vpop.f32.mrb[7].mxu0  ;;  %v1882_v47 = vpop.f32.mrb[7].mxu1 }
 0x3cf   :  { %2084 = vtanh.f32 %v279_v45 }
 0x3d7   :  { %v2083_v48 = vpop.eup %2082 }
 0x3d8   :  { %v344_v49 = vadd.f32 1.0, %v2083_v48 }
 0x3d9   :  { %v2085_v50 = vpop.eup %2084 }
 0x3da   :  { %v345_v51 = vmul.f32 0.5, %v344_v49  ;;  %v281_v52 = vadd.f32 1.0, %v2085_v50 }
 0x3dc   :  { %v346_v53 = vsel %vm2355_vm3, %v2083_v48, %v345_v51  ;;  %v282_v54 = vmul.f32 0.5, %v281_v52 }
 0x3dd   :  { %349 = vrot.lane.b32.xlu1 %v346_v53, %s2244_s0  ;;  %v347_v60 = vmul.f32 %v346_v53, %v2363_v21 }
 0x3de   :  { %v283_v55 = vsel %vm2355_vm3, %v2085_v50, %v282_v54 }
 0x3df   :  { %286 = vrot.lane.b32.xlu0 %v283_v55, %s2244_s0  ;;  %v284_v63 = vmul.f32 0.0, %v283_v55 }
 0x44f   :  { %v350_v56 = vpop.permute.xlu1 %349 }
 0x450   :  { %v352_v57 = vmul.f32 %v350_v56, %v346_v53 }
 0x451   :  { %v287_v58 = vpop.permute.xlu0 %286 }
 0x452   :  { %v289_v59 = vmul.f32 %v287_v58, %v283_v55  ;;  %354 = vrot.lane.b32.xlu1 %v352_v57, %s2249_s23 }
 0x454   :  { %291 = vrot.lane.b32.xlu0 %v289_v59, %s2249_s23 }
 0x4c4   :  { %v355_v61 = vpop.permute.xlu1 %354 }
 0x4c5   :  { %v2425_v62 = vadd.f32 %v355_v61, %v347_v60 }
 0x4c6   :  { %v292_v3 = vpop.permute.xlu0 %291 }
 0x4c7   :  { %2086 = vtanh.f32 %v2425_v62  ;;  %v2428_v4 = vadd.f32 %v292_v3, %v284_v63 }
 0x4c9   :  { %2088 = vtanh.f32 %v2428_v4 }
 0x4d1   :  { %v2087_v5 = vpop.eup %2086 }
 0x4d2   :  { %360 = vrot.lane.b32.xlu1 %v2087_v5, %s2244_s0 }
 0x4d3   :  { %v2089_v6 = vpop.eup %2088 }
 0x4d4   :  { %297 = vrot.lane.b32.xlu0 %v2089_v6, %s2244_s0 }
 0x544   :  { %v361_v7 = vpop.permute.xlu1 %360 }
 0x545   :  { %v363_v8 = vmul.f32 %v361_v7, %v346_v53 }
 0x546   :  { %v298_v9 = vpop.permute.xlu0 %297 }
 0x547   :  { %v364_v10 = vpack.c.bf16 %v363_v8, %v363_v8  ;;  %v300_v11 = vmul.f32 %v298_v9, %v283_v55  ;;  %v659_v9 = vld [vmem:[#allocation2 + $0x18] sm:$0xff] }
 0x549   :  { %v365_v12 = vpack.c.bf16 %v300_v11, %v300_v11  ;;  %413 = vrot.lane.b32.xlu1 %v364_v10, %s2249_s23 }
 0x54b   :  { %367 = vrot.lane.b32.xlu0 %v365_v12, %s2249_s23 }
 0x5bb   :  { %v414_v13 = vpop.permute.xlu1 %413 }
 0x5bc   :  { %1896 = vmatmul.mubr.msk.bf16.vlgmr.msra.gmra.mrb[8].mxu1 %vm102_vm4, %v414_v13 }
 0x5bd   :  { %v368_v15 = vpop.permute.xlu0 %367  ;;  %1908 = vmatpush3.bf16.msra.mxu1 %v2369_v22  ;;  %1911 = vmatprep.mubr.msk.bf16.mxu1 %vm2247_vm0, %v2246_v0 }
 0x5be   :  { %1888 = vmatmul.mubr.msk.bf16.vlgmr.msra.gmra.mrb[8].mxu0 %vm102_vm4, %v368_v15  ;;  %1909 = vmatprep.subr.bf16.mxu1 %v2246_v0 }
 0x5bf   :  { %1900 = vmatpush3.bf16.msra.mxu0 %v2342_v1  ;;  %1903 = vmatprep.mubr.msk.bf16.mxu0 %vm2247_vm0, %v2246_v0 }
 0x5c0   :  { %1901 = vmatprep.subr.bf16.mxu0 %v2246_v0 }
 0x5c1   :  { %1910 = vmatpush3.bf16.msra.mxu1 %v2377_v24 }
 0x5c2   :  { %1923 = vmatprep.subr.bf16.mxu1 %v2246_v0 }
 0x5c3   :  { %1902 = vmatpush3.bf16.msra.mxu0 %v2348_v2 }
 0x5c4   :  { %1915 = vmatprep.subr.bf16.mxu0 %v2246_v0 }
 0x5c6   :  { %1904 = vmatmul.mubr.msk.bf16.vlgmr.msra.gmra.mrb[12].mxu0 %vm102_vm4, %v414_v13 }
 0x5c7   :  { %1916 = vmatpush3.bf16.msra.mxu0 %v2371_v23  ;;  %1919 = vmatprep.mubr.msk.bf16.mxu0 %vm2247_vm0, %v2246_v0 }
 0x5c8   :  { %1917 = vmatprep.subr.bf16.mxu0 %v2246_v0 }
 0x5cb   :  { %1918 = vmatpush3.bf16.msra.mxu0 %v2380_v25 }
 0x5cc   :  { %1931 = vmatprep.subr.bf16.mxu0 %v2246_v0 }
 0x68f   :  { %v452_v16 = vpop.f32.mrb[8].mxu1 }
 0x690   :  { %v1897_v17 = vpop.f32.mrb[9].mxu1 }
 0x691   :  { %v406_v18 = vpop.f32.mrb[8].mxu0  ;;  %v455_v19 = vpop.f32.mrb[10].mxu1 }
 0x692   :  { %v453_v20 = vadd.f32 %v452_v16, %v406_v18  ;;  %v1889_v21 = vpop.f32.mrb[9].mxu0  ;;  %v1898_v26 = vpop.f32.mrb[11].mxu1 }
 0x693   :  { %v409_v27 = vpop.f32.mrb[10].mxu0 }
 0x694   :  { %v458_v28 = vadd.f32 %v2413_v36, %v453_v20  ;;  %v1890_v29 = vpop.f32.mrb[11].mxu0 }
 0x696   :  { %2090 = vtanh.f32 %v458_v28 }
 0x699   :  { %v515_v31 = vpop.f32.mrb[12].mxu0 }
 0x69a   :  { %v521_v32 = vadd.f32 %v515_v31, %v480_v30  ;;  %v1905_v33 = vpop.f32.mrb[13].mxu0 }
 0x69b   :  { %v518_v34 = vpop.f32.mrb[14].mxu0 }
 0x69c   :  { %2092 = vtanh.f32 %v521_v32  ;;  %v1906_v35 = vpop.f32.mrb[15].mxu0 }
 0x6a0   :  { %v2091_v37 = vpop.eup %2090 }
 0x6a1   :  { %v460_v38 = vadd.f32 1.0, %v2091_v37 }
 0x6a3   :  { %v461_v39 = vmul.f32 0.5, %v460_v38 }
 0x6a5   :  { %v462_v40 = vsel %vm2355_vm3, %v2091_v37, %v461_v39 }
 0x6a6   :  { %v2093_v41 = vpop.eup %2092  ;;  %465 = vrot.lane.b32.xlu0 %v462_v40, %s2244_s0  ;;  %v463_v49 = vmul.f32 %v462_v40, %v2428_v4 }
 0x6a7   :  { %v523_v42 = vadd.f32 1.0, %v2093_v41 }
 0x6a9   :  { %v524_v43 = vmul.f32 0.5, %v523_v42 }
 0x6ab   :  { %v525_v44 = vsel %vm2355_vm3, %v2093_v41, %v524_v43 }
 0x6ac   :  { %528 = vrot.lane.b32.xlu1 %v525_v44, %s2244_s0  ;;  %v526_v52 = vmul.f32 %v525_v44, %v2425_v62 }
 0x718   :  { %v466_v45 = vpop.permute.xlu0 %465 }
 0x719   :  { %v468_v46 = vmul.f32 %v466_v45, %v462_v40 }
 0x71b   :  { %470 = vrot.lane.b32.xlu0 %v468_v46, %s2249_s23 }
 0x71e   :  { %v529_v47 = vpop.permute.xlu1 %528 }
 0x71f   :  { %v531_v48 = vmul.f32 %v529_v47, %v525_v44 }
 0x721   :  { %533 = vrot.lane.b32.xlu1 %v531_v48, %s2249_s23 }
 0x78d   :  { %v471_v50 = vpop.permute.xlu0 %470 }
 0x78e   :  { %v2466_v51 = vadd.f32 %v471_v50, %v463_v49 }
 0x790   :  { %2094 = vtanh.f32 %v2466_v51 }
 0x793   :  { %v534_v53 = vpop.permute.xlu1 %533 }
 0x794   :  { %v2470_v54 = vadd.f32 %v534_v53, %v526_v52 }
 0x796   :  { %2096 = vtanh.f32 %v2470_v54 }
 0x79a   :  { %v2095_v55 = vpop.eup %2094 }
 0x79b   :  { %476 = vrot.lane.b32.xlu0 %v2095_v55, %s2244_s0 }
 0x7a0   :  { %v2097_v56 = vpop.eup %2096 }
 0x7a1   :  { %539 = vrot.lane.b32.xlu1 %v2097_v56, %s2244_s0 }
 0x80d   :  { %v477_v57 = vpop.permute.xlu0 %476 }
 0x80e   :  { %v479_v58 = vmul.f32 %v477_v57, %v462_v40 }
 0x810   :  { %v544_v59 = vpack.c.bf16 %v479_v58, %v479_v58 }
 0x812   :  { %546 = vrot.lane.b32.xlu0 %v544_v59, %s2249_s23 }
 0x813   :  { %v540_v60 = vpop.permute.xlu1 %539 }
 0x814   :  { %v542_v61 = vmul.f32 %v540_v60, %v525_v44 }
 0x816   :  { %v543_v63 = vpack.c.bf16 %v542_v61, %v542_v61 }
 0x818   :  { %592 = vrot.lane.b32.xlu1 %v543_v63, %s2249_s23 }
 0x884   :  { %v547_v62 = vpop.permute.xlu0 %546 }
 0x885   :  { %1912 = vmatmul.mubr.msk.bf16.vlgmr.msra.gmra.mrb[12].mxu1 %vm102_vm4, %v547_v62 }
 0x886   :  { %1924 = vmatpush3.bf16.msra.mxu1 %v2342_v1  ;;  %1927 = vmatprep.mubr.msk.bf16.mxu1 %vm2247_vm0, %v2246_v0 }
 0x887   :  { %1925 = vmatprep.subr.bf16.mxu1 %v2246_v0 }
 0x88a   :  { %1926 = vmatpush3.bf16.msra.mxu1 %v2348_v2  ;;  %v593_v3 = vpop.permute.xlu1 %592 }
 0x88b   :  { %1920 = vmatmul.mubr.msk.bf16.vlgmr.msra.gmra.mrb[16].mxu0 %vm102_vm4, %v593_v3  ;;  %1939 = vmatprep.subr.bf16.mxu1 %v2246_v0 }
 0x88c   :  { %1932 = vmatpush3.bf16.msra.mxu0 %v2369_v22  ;;  %1935 = vmatprep.mubr.msk.bf16.mxu0 %vm2247_vm0, %v2246_v0 }
 0x88d   :  { %1928 = vmatmul.mubr.msk.bf16.vlgmr.msra.gmra.mrb[16].mxu1 %vm102_vm4, %v593_v3  ;;  %1933 = vmatprep.subr.bf16.mxu0 %v2246_v0  ;;  %v838_v3 = vld [vmem:[#allocation2 + $0x20] sm:$0xff] }
 0x88e   :  { %1940 = vmatpush3.bf16.msra.mxu1 %v2371_v23  ;;  %1943 = vmatprep.mubr.msk.bf16.mxu1 %vm2247_vm0, %v2246_v0 }
 0x88f   :  { %1941 = vmatprep.subr.bf16.mxu1 %v2246_v0 }
 0x890   :  { %1934 = vmatpush3.bf16.msra.mxu0 %v2377_v24 }
 0x891   :  { %1947 = vmatprep.subr.bf16.mxu0 %v2246_v0 }
 0x892   :  { %1942 = vmatpush3.bf16.msra.mxu1 %v2380_v25 }
 0x893   :  { %1955 = vmatprep.subr.bf16.mxu1 %v2246_v0 }
 0x958   :  { %v585_v4 = vpop.f32.mrb[12].mxu1 }
 0x959   :  { %v1913_v5 = vpop.f32.mrb[13].mxu1 }
 0x95a   :  { %v588_v6 = vpop.f32.mrb[14].mxu1 }
 0x95b   :  { %v1914_v7 = vpop.f32.mrb[15].mxu1 }
 0x95e   :  { %v631_v8 = vpop.f32.mrb[16].mxu0 }
 0x95f   :  { %v632_v10 = vadd.f32 %v631_v8, %v585_v4  ;;  %v1921_v11 = vpop.f32.mrb[17].mxu0 }
 0x960   :  { %v634_v12 = vpop.f32.mrb[18].mxu0  ;;  %v694_v13 = vpop.f32.mrb[16].mxu1 }
 0x961   :  { %v637_v15 = vadd.f32 %v2413_v36, %v632_v10  ;;  %v700_v16 = vadd.f32 %v694_v13, %v659_v9  ;;  %v1922_v17 = vpop.f32.mrb[19].mxu0  ;;  %v1929_v18 = vpop.f32.mrb[17].mxu1 }
 0x962   :  { %v697_v19 = vpop.f32.mrb[18].mxu1 }
 0x963   :  { %2098 = vtanh.f32 %v637_v15  ;;  %v1930_v20 = vpop.f32.mrb[19].mxu1 }
 0x964   :  { %2100 = vtanh.f32 %v700_v16 }
 0x96d   :  { %v2099_v21 = vpop.eup %2098 }
 0x96e   :  { %v2101_v26 = vpop.eup %2100  ;;  %v639_v27 = vadd.f32 1.0, %v2099_v21 }
 0x96f   :  { %v702_v28 = vadd.f32 1.0, %v2101_v26 }
 0x970   :  { %v640_v29 = vmul.f32 0.5, %v639_v27 }
 0x971   :  { %v703_v30 = vmul.f32 0.5, %v702_v28 }
 0x972   :  { %v641_v31 = vsel %vm2355_vm3, %v2099_v21, %v640_v29 }
 0x973   :  { %v704_v32 = vsel %vm2355_vm3, %v2101_v26, %v703_v30  ;;  %644 = vrot.lane.b32.xlu0 %v641_v31, %s2244_s0  ;;  %v642_v38 = vmul.f32 %v641_v31, %v2466_v51 }
 0x974   :  { %707 = vrot.lane.b32.xlu1 %v704_v32, %s2244_s0  ;;  %v705_v39 = vmul.f32 %v704_v32, %v2470_v54 }
 0x9e5   :  { %v645_v33 = vpop.permute.xlu0 %644 }
 0x9e6   :  { %v708_v34 = vpop.permute.xlu1 %707  ;;  %v647_v35 = vmul.f32 %v645_v33, %v641_v31 }
 0x9e7   :  { %v710_v37 = vmul.f32 %v708_v34, %v704_v32 }
 0x9e8   :  { %649 = vrot.lane.b32.xlu0 %v647_v35, %s2249_s23 }
 0x9e9   :  { %712 = vrot.lane.b32.xlu1 %v710_v37, %s2249_s23 }
 0xa5a   :  { %v650_v40 = vpop.permute.xlu0 %649 }
 0xa5b   :  { %v713_v41 = vpop.permute.xlu1 %712  ;;  %v2509_v42 = vadd.f32 %v650_v40, %v642_v38 }
 0xa5c   :  { %v2511_v43 = vadd.f32 %v713_v41, %v705_v39 }
 0xa5d   :  { %2102 = vtanh.f32 %v2509_v42 }
 0xa5e   :  { %2104 = vtanh.f32 %v2511_v43 }
 0xa67   :  { %v2103_v44 = vpop.eup %2102 }
 0xa68   :  { %v2105_v45 = vpop.eup %2104  ;;  %655 = vrot.lane.b32.xlu0 %v2103_v44, %s2244_s0 }
 0xa69   :  { %718 = vrot.lane.b32.xlu1 %v2105_v45, %s2244_s0 }
 0xada   :  { %v656_v46 = vpop.permute.xlu0 %655 }
 0xadb   :  { %v719_v47 = vpop.permute.xlu1 %718  ;;  %v658_v48 = vmul.f32 %v656_v46, %v641_v31 }
 0xadc   :  { %v721_v49 = vmul.f32 %v719_v47, %v704_v32 }
 0xadd   :  { %v723_v50 = vpack.c.bf16 %v658_v48, %v658_v48 }
 0xade   :  { %v722_v51 = vpack.c.bf16 %v721_v49, %v721_v49 }
 0xadf   :  { %725 = vrot.lane.b32.xlu0 %v723_v50, %s2249_s23  ;;  %v1017_v50 = vld [vmem:[#allocation2 + $0x28] sm:$0xff] }
 0xae0   :  { %771 = vrot.lane.b32.xlu1 %v722_v51, %s2249_s23 }
 0xb51   :  { %v726_v52 = vpop.permute.xlu0 %725 }
 0xb52   :  { %v772_v53 = vpop.permute.xlu1 %771  ;;  %1936 = vmatmul.mubr.msk.bf16.vlgmr.msra.gmra.mrb[20].mxu0 %vm102_vm4, %v726_v52 }
 0xb53   :  { %1944 = vmatmul.mubr.msk.bf16.vlgmr.msra.gmra.mrb[20].mxu1 %vm102_vm4, %v772_v53  ;;  %1948 = vmatpush3.bf16.msra.mxu0 %v2342_v1 }
 0xb54   :  { %1949 = vmatprep.subr.bf16.mxu0 %v2246_v0  ;;  %1951 = vmatprep.mubr.msk.bf16.mxu0 %vm2247_vm0, %v2246_v0 }
 0xb55   :  { %1956 = vmatpush3.bf16.msra.mxu1 %v2369_v22  ;;  %1959 = vmatprep.mubr.msk.bf16.mxu1 %vm2247_vm0, %v2246_v0 }
 0xb56   :  { %1957 = vmatprep.subr.bf16.mxu1 %v2246_v0 }
 0xb57   :  { %1950 = vmatpush3.bf16.msra.mxu0 %v2348_v2 }
 0xb58   :  { %1963 = vmatprep.subr.bf16.mxu0 %v2246_v0 }
 0xb59   :  { %1958 = vmatpush3.bf16.msra.mxu1 %v2377_v24 }
 0xb5a   :  { %1952 = vmatmul.mubr.msk.bf16.vlgmr.msra.gmra.mrb[24].mxu0 %vm102_vm4, %v772_v53  ;;  %1971 = vmatprep.subr.bf16.mxu1 %v2246_v0 }
 0xb5b   :  { %1964 = vmatpush3.bf16.msra.mxu0 %v2371_v23  ;;  %1967 = vmatprep.mubr.msk.bf16.mxu0 %vm2247_vm0, %v2246_v0 }
 0xb5c   :  { %1965 = vmatprep.subr.bf16.mxu0 %v2246_v0 }
 0xb5f   :  { %1966 = vmatpush3.bf16.msra.mxu0 %v2380_v25 }
 0xb60   :  { %1979 = vmatprep.subr.bf16.mxu0 %v2246_v0 }
 0xc25   :  { %v764_v54 = vpop.f32.mrb[20].mxu0 }
 0xc26   :  { %v810_v55 = vpop.f32.mrb[20].mxu1  ;;  %v1937_v56 = vpop.f32.mrb[21].mxu0 }
 0xc27   :  { %v811_v57 = vadd.f32 %v810_v55, %v764_v54  ;;  %v1945_v58 = vpop.f32.mrb[21].mxu1  ;;  %v767_v59 = vpop.f32.mrb[22].mxu0 }
 0xc28   :  { %v813_v60 = vpop.f32.mrb[22].mxu1  ;;  %v1938_v61 = vpop.f32.mrb[23].mxu0 }
 0xc29   :  { %v816_v63 = vadd.f32 %v2413_v36, %v811_v57  ;;  %v1946_v62 = vpop.f32.mrb[23].mxu1 }
 0xc2b   :  { %2106 = vtanh.f32 %v816_v63 }
 0xc2d   :  { %v873_v4 = vpop.f32.mrb[24].mxu0 }
 0xc2e   :  { %v879_v5 = vadd.f32 %v873_v4, %v838_v3  ;;  %v1953_v6 = vpop.f32.mrb[25].mxu0 }
 0xc2f   :  { %v876_v7 = vpop.f32.mrb[26].mxu0 }
 0xc30   :  { %2108 = vtanh.f32 %v879_v5  ;;  %v1954_v8 = vpop.f32.mrb[27].mxu0 }
 0xc35   :  { %v2107_v9 = vpop.eup %2106 }
 0xc36   :  { %v818_v10 = vadd.f32 1.0, %v2107_v9 }
 0xc38   :  { %v819_v11 = vmul.f32 0.5, %v818_v10 }
 0xc3a   :  { %v2109_v12 = vpop.eup %2108  ;;  %v820_v13 = vsel %vm2355_vm3, %v2107_v9, %v819_v11 }
 0xc3b   :  { %823 = vrot.lane.b32.xlu0 %v820_v13, %s2244_s0  ;;  %v881_v15 = vadd.f32 1.0, %v2109_v12  ;;  %v821_v26 = vmul.f32 %v820_v13, %v2509_v42 }
 0xc3d   :  { %v882_v16 = vmul.f32 0.5, %v881_v15 }
 0xc3f   :  { %v883_v17 = vsel %vm2355_vm3, %v2109_v12, %v882_v16 }
 0xc40   :  { %886 = vrot.lane.b32.xlu1 %v883_v17, %s2244_s0  ;;  %v884_v29 = vmul.f32 %v883_v17, %v2511_v43 }
 0xcad   :  { %v824_v18 = vpop.permute.xlu0 %823 }
 0xcae   :  { %v826_v19 = vmul.f32 %v824_v18, %v820_v13 }
 0xcb0   :  { %828 = vrot.lane.b32.xlu0 %v826_v19, %s2249_s23 }
 0xcb2   :  { %v887_v20 = vpop.permute.xlu1 %886 }
 0xcb3   :  { %v889_v21 = vmul.f32 %v887_v20, %v883_v17 }
 0xcb5   :  { %891 = vrot.lane.b32.xlu1 %v889_v21, %s2249_s23 }
 0xd22   :  { %v829_v27 = vpop.permute.xlu0 %828 }
 0xd23   :  { %v2550_v28 = vadd.f32 %v829_v27, %v821_v26 }
 0xd25   :  { %2110 = vtanh.f32 %v2550_v28 }
 0xd27   :  { %v892_v30 = vpop.permute.xlu1 %891 }
 0xd28   :  { %v2554_v31 = vadd.f32 %v892_v30, %v884_v29 }
 0xd2a   :  { %2112 = vtanh.f32 %v2554_v31 }
 0xd2f   :  { %v2111_v32 = vpop.eup %2110 }
 0xd30   :  { %834 = vrot.lane.b32.xlu0 %v2111_v32, %s2244_s0 }
 0xd34   :  { %v2113_v33 = vpop.eup %2112 }
 0xd35   :  { %897 = vrot.lane.b32.xlu1 %v2113_v33, %s2244_s0 }
 0xda2   :  { %v835_v34 = vpop.permute.xlu0 %834 }
 0xda3   :  { %v837_v35 = vmul.f32 %v835_v34, %v820_v13 }
 0xda5   :  { %v902_v37 = vpack.c.bf16 %v837_v35, %v837_v35 }
 0xda7   :  { %904 = vrot.lane.b32.xlu0 %v902_v37, %s2249_s23  ;;  %v898_v38 = vpop.permute.xlu1 %897 }
 0xda8   :  { %v900_v39 = vmul.f32 %v898_v38, %v883_v17 }
 0xdaa   :  { %v901_v40 = vpack.c.bf16 %v900_v39, %v900_v39 }
 0xdac   :  { %950 = vrot.lane.b32.xlu1 %v901_v40, %s2249_s23  ;;  %v1196_v40 = vld [vmem:[#allocation2 + $0x30] sm:$0xff] }
 0xe19   :  { %v905_v41 = vpop.permute.xlu0 %904 }
 0xe1a   :  { %1960 = vmatmul.mubr.msk.bf16.vlgmr.msra.gmra.mrb[24].mxu1 %vm102_vm4, %v905_v41 }
 0xe1b   :  { %1972 = vmatpush3.bf16.msra.mxu1 %v2342_v1  ;;  %1975 = vmatprep.mubr.msk.bf16.mxu1 %vm2247_vm0, %v2246_v0 }
 0xe1c   :  { %1973 = vmatprep.subr.bf16.mxu1 %v2246_v0 }
 0xe1e   :  { %v951_v42 = vpop.permute.xlu1 %950 }
 0xe1f   :  { %1974 = vmatpush3.bf16.msra.mxu1 %v2348_v2  ;;  %1968 = vmatmul.mubr.msk.bf16.vlgmr.msra.gmra.mrb[28].mxu0 %vm102_vm4, %v951_v42 }
 0xe20   :  { %1987 = vmatprep.subr.bf16.mxu1 %v2246_v0  ;;  %1980 = vmatpush3.bf16.msra.mxu0 %v2369_v22 }
 0xe21   :  { %1981 = vmatprep.subr.bf16.mxu0 %v2246_v0  ;;  %1983 = vmatprep.mubr.msk.bf16.mxu0 %vm2247_vm0, %v2246_v0 }
 0xe22   :  { %1976 = vmatmul.mubr.msk.bf16.vlgmr.msra.gmra.mrb[28].mxu1 %vm102_vm4, %v951_v42 }
 0xe23   :  { %1988 = vmatpush3.bf16.msra.mxu1 %v2371_v23  ;;  %1991 = vmatprep.mubr.msk.bf16.mxu1 %vm2247_vm0, %v2246_v0 }
 0xe24   :  { %1989 = vmatprep.subr.bf16.mxu1 %v2246_v0  ;;  %1982 = vmatpush3.bf16.msra.mxu0 %v2377_v24 }
 0xe25   :  { %1995 = vmatprep.subr.bf16.mxu0 %v2246_v0 }
 0xe27   :  { %1990 = vmatpush3.bf16.msra.mxu1 %v2380_v25 }
 0xe28   :  { %2003 = vmatprep.subr.bf16.mxu1 %v2246_v0 }
 0xeed   :  { %v943_v43 = vpop.f32.mrb[24].mxu1 }
 0xeee   :  { %v1961_v44 = vpop.f32.mrb[25].mxu1 }
 0xeef   :  { %v946_v45 = vpop.f32.mrb[26].mxu1 }
 0xef0   :  { %v1962_v46 = vpop.f32.mrb[27].mxu1 }
 0xef2   :  { %v989_v47 = vpop.f32.mrb[28].mxu0 }
 0xef3   :  { %v990_v48 = vadd.f32 %v989_v47, %v943_v43  ;;  %v1969_v49 = vpop.f32.mrb[29].mxu0 }
 0xef4   :  { %v992_v51 = vpop.f32.mrb[30].mxu0 }
 0xef5   :  { %v995_v52 = vadd.f32 %v2413_v36, %v990_v48  ;;  %v1052_v53 = vpop.f32.mrb[28].mxu1  ;;  %v1970_v54 = vpop.f32.mrb[31].mxu0 }
 0xef6   :  { %v1058_v55 = vadd.f32 %v1052_v53, %v1017_v50  ;;  %v1977_v56 = vpop.f32.mrb[29].mxu1 }
 0xef7   :  { %2114 = vtanh.f32 %v995_v52  ;;  %v1055_v57 = vpop.f32.mrb[30].mxu1 }
 0xef8   :  { %2116 = vtanh.f32 %v1058_v55  ;;  %v1978_v58 = vpop.f32.mrb[31].mxu1 }
 0xf01   :  { %v2115_v59 = vpop.eup %2114 }
 0xf02   :  { %v2117_v60 = vpop.eup %2116  ;;  %v997_v61 = vadd.f32 1.0, %v2115_v59 }
 0xf03   :  { %v1060_v63 = vadd.f32 1.0, %v2117_v60 }
 0xf04   :  { %v998_v62 = vmul.f32 0.5, %v997_v61 }
 0xf05   :  { %v1061_v3 = vmul.f32 0.5, %v1060_v63 }
 0xf06   :  { %v999_v4 = vsel %vm2355_vm3, %v2115_v59, %v998_v62 }
 0xf07   :  { %v1062_v5 = vsel %vm2355_vm3, %v2117_v60, %v1061_v3  ;;  %1002 = vrot.lane.b32.xlu0 %v999_v4, %s2244_s0  ;;  %v1000_v10 = vmul.f32 %v999_v4, %v2550_v28 }
 0xf08   :  { %1065 = vrot.lane.b32.xlu1 %v1062_v5, %s2244_s0  ;;  %v1063_v11 = vmul.f32 %v1062_v5, %v2554_v31 }
 0xf79   :  { %v1003_v6 = vpop.permute.xlu0 %1002 }
 0xf7a   :  { %v1066_v7 = vpop.permute.xlu1 %1065  ;;  %v1005_v8 = vmul.f32 %v1003_v6, %v999_v4 }
 0xf7b   :  { %v1068_v9 = vmul.f32 %v1066_v7, %v1062_v5 }
 0xf7c   :  { %1007 = vrot.lane.b32.xlu0 %v1005_v8, %s2249_s23 }
 0xf7d   :  { %1070 = vrot.lane.b32.xlu1 %v1068_v9, %s2249_s23 }
 0xfee   :  { %v1008_v12 = vpop.permute.xlu0 %1007 }
 0xfef   :  { %v1071_v13 = vpop.permute.xlu1 %1070  ;;  %v2593_v15 = vadd.f32 %v1008_v12, %v1000_v10  ;;  %v2142_v12 = vld [vmem:[%s2745_s1] sm:$0xff]  }
 0xff0   :  { %v2595_v16 = vadd.f32 %v1071_v13, %v1063_v11 }
 0xff1   :  { %2118 = vtanh.f32 %v2593_v15 }
 0xff2   :  { %2120 = vtanh.f32 %v2595_v16 }
 0xffb   :  { %v2119_v17 = vpop.eup %2118 }
 0xffc   :  { %v2121_v18 = vpop.eup %2120  ;;  %1013 = vrot.lane.b32.xlu0 %v2119_v17, %s2244_s0 }
 0xffd   :  { %1076 = vrot.lane.b32.xlu1 %v2121_v18, %s2244_s0 }
0x106e   :  { %v1014_v19 = vpop.permute.xlu0 %1013 }
0x106f   :  { %v1077_v20 = vpop.permute.xlu1 %1076  ;;  %v1016_v21 = vmul.f32 %v1014_v19, %v999_v4 }
0x1070   :  { %v1079_v26 = vmul.f32 %v1077_v20, %v1062_v5 }
0x1071   :  { %v1081_v27 = vpack.c.bf16 %v1016_v21, %v1016_v21  ;;  %v1375_v21 = vld [vmem:[#allocation2 + $0x38] sm:$0xff] }
0x1072   :  { %v1080_v28 = vpack.c.bf16 %v1079_v26, %v1079_v26 }
0x1073   :  { %1083 = vrot.lane.b32.xlu0 %v1081_v27, %s2249_s23 }
0x1074   :  { %1129 = vrot.lane.b32.xlu1 %v1080_v28, %s2249_s23 }
0x10e5   :  { %v1084_v29 = vpop.permute.xlu0 %1083 }
0x10e6   :  { %v1130_v30 = vpop.permute.xlu1 %1129  ;;  %1984 = vmatmul.mubr.msk.bf16.vlgmr.msra.gmra.mrb[32].mxu0 %vm102_vm4, %v1084_v29 }
0x10e7   :  { %1992 = vmatmul.mubr.msk.bf16.vlgmr.msra.gmra.mrb[32].mxu1 %vm102_vm4, %v1130_v30  ;;  %1996 = vmatpush3.bf16.msra.mxu0 %v2342_v1 }
0x10e8   :  { %1997 = vmatprep.subr.bf16.mxu0 %v2246_v0  ;;  %1999 = vmatprep.mubr.msk.bf16.mxu0 %vm2247_vm0, %v2246_v0 }
0x10e9   :  { %2004 = vmatpush3.bf16.msra.mxu1 %v2369_v22  ;;  %2007 = vmatprep.mubr.msk.bf16.mxu1 %vm2247_vm0, %v2246_v0 }
0x10ea   :  { %2005 = vmatprep.subr.bf16.mxu1 %v2246_v0 }
0x10eb   :  { %1998 = vmatpush3.bf16.msra.mxu0 %v2348_v2 }
0x10ec   :  { %2011 = vmatprep.subr.bf16.mxu0 %v2246_v0 }
0x10ed   :  { %2006 = vmatpush3.bf16.msra.mxu1 %v2377_v24 }
0x10ee   :  { %2000 = vmatmul.mubr.msk.bf16.vlgmr.msra.gmra.mrb[36].mxu0 %vm102_vm4, %v1130_v30  ;;  %2019 = vmatprep.subr.bf16.mxu1 %v2246_v0 }
0x10ef   :  { %2012 = vmatpush3.bf16.msra.mxu0 %v2371_v23  ;;  %2015 = vmatprep.mubr.msk.bf16.mxu0 %vm2247_vm0, %v2246_v0 }
0x10f0   :  { %2013 = vmatprep.subr.bf16.mxu0 %v2246_v0 }
0x10f3   :  { %2014 = vmatpush3.bf16.msra.mxu0 %v2380_v25 }
0x10f4   :  { %2027 = vmatprep.subr.bf16.mxu0 %v2246_v0 }
0x11b9   :  { %v1122_v1 = vpop.f32.mrb[32].mxu0 }
0x11ba   :  { %v1168_v2 = vpop.f32.mrb[32].mxu1  ;;  %v1985_v31 = vpop.f32.mrb[33].mxu0 }
0x11bb   :  { %v1169_v32 = vadd.f32 %v1168_v2, %v1122_v1  ;;  %v1993_v33 = vpop.f32.mrb[33].mxu1  ;;  %v1125_v34 = vpop.f32.mrb[34].mxu0 }
0x11bc   :  { %v1171_v35 = vpop.f32.mrb[34].mxu1  ;;  %v1986_v37 = vpop.f32.mrb[35].mxu0 }
0x11bd   :  { %v1174_v38 = vadd.f32 %v2413_v36, %v1169_v32  ;;  %v1994_v39 = vpop.f32.mrb[35].mxu1 }
0x11bf   :  { %2122 = vtanh.f32 %v1174_v38 }
0x11c1   :  { %v1231_v41 = vpop.f32.mrb[36].mxu0 }
0x11c2   :  { %v1237_v42 = vadd.f32 %v1231_v41, %v1196_v40  ;;  %v2001_v43 = vpop.f32.mrb[37].mxu0 }
0x11c3   :  { %v1234_v44 = vpop.f32.mrb[38].mxu0 }
0x11c4   :  { %2124 = vtanh.f32 %v1237_v42  ;;  %v2002_v45 = vpop.f32.mrb[39].mxu0 }
0x11c9   :  { %v2123_v46 = vpop.eup %2122 }
0x11ca   :  { %v1176_v47 = vadd.f32 1.0, %v2123_v46 }
0x11cc   :  { %v1177_v48 = vmul.f32 0.5, %v1176_v47 }
0x11ce   :  { %v2125_v49 = vpop.eup %2124  ;;  %v1178_v50 = vsel %vm2355_vm3, %v2123_v46, %v1177_v48 }
0x11cf   :  { %1181 = vrot.lane.b32.xlu0 %v1178_v50, %s2244_s0  ;;  %v1239_v51 = vadd.f32 1.0, %v2125_v49  ;;  %v1179_v58 = vmul.f32 %v1178_v50, %v2593_v15  ;;  %v2143_v15 = vld [vmem:[%s2745_s1 + $0x8] sm:$0xff]  }
0x11d1   :  { %v1240_v52 = vmul.f32 0.5, %v1239_v51 }
0x11d3   :  { %v1241_v53 = vsel %vm2355_vm3, %v2125_v49, %v1240_v52 }
0x11d4   :  { %1244 = vrot.lane.b32.xlu1 %v1241_v53, %s2244_s0  ;;  %v1242_v61 = vmul.f32 %v1241_v53, %v2595_v16 }
0x1241   :  { %v1182_v54 = vpop.permute.xlu0 %1181 }
0x1242   :  { %v1184_v55 = vmul.f32 %v1182_v54, %v1178_v50 }
0x1244   :  { %1186 = vrot.lane.b32.xlu0 %v1184_v55, %s2249_s23 }
0x1246   :  { %v1245_v56 = vpop.permute.xlu1 %1244 }
0x1247   :  { %v1247_v57 = vmul.f32 %v1245_v56, %v1241_v53 }
0x1249   :  { %1249 = vrot.lane.b32.xlu1 %v1247_v57, %s2249_s23 }
0x12b6   :  { %v1187_v59 = vpop.permute.xlu0 %1186 }
0x12b7   :  { %v2634_v60 = vadd.f32 %v1187_v59, %v1179_v58 }
0x12b9   :  { %2126 = vtanh.f32 %v2634_v60 }
0x12bb   :  { %v1250_v63 = vpop.permute.xlu1 %1249 }
0x12bc   :  { %v2638_v62 = vadd.f32 %v1250_v63, %v1242_v61 }
0x12be   :  { %2128 = vtanh.f32 %v2638_v62 }
0x12c3   :  { %v2127_v3 = vpop.eup %2126 }
0x12c4   :  { %1192 = vrot.lane.b32.xlu0 %v2127_v3, %s2244_s0 }
0x12c8   :  { %v2129_v4 = vpop.eup %2128 }
0x12c9   :  { %1255 = vrot.lane.b32.xlu1 %v2129_v4, %s2244_s0 }
0x1336   :  { %v1193_v5 = vpop.permute.xlu0 %1192 }
0x1337   :  { %v1195_v6 = vmul.f32 %v1193_v5, %v1178_v50 }
0x1339   :  { %v1260_v7 = vpack.c.bf16 %v1195_v6, %v1195_v6 }
0x133b   :  { %1262 = vrot.lane.b32.xlu0 %v1260_v7, %s2249_s23  ;;  %v1256_v8 = vpop.permute.xlu1 %1255 }
0x133c   :  { %v1258_v9 = vmul.f32 %v1256_v8, %v1241_v53 }
0x133e   :  { %v1259_v10 = vpack.c.bf16 %v1258_v9, %v1258_v9 }
0x1340   :  { %1308 = vrot.lane.b32.xlu1 %v1259_v10, %s2249_s23 }
0x13ad   :  { %v1263_v11 = vpop.permute.xlu0 %1262 }
0x13ae   :  { %2008 = vmatmul.mubr.msk.bf16.vlgmr.msra.gmra.mrb[36].mxu1 %vm102_vm4, %v1263_v11 }
0x13af   :  { %2020 = vmatpush3.bf16.msra.mxu1 %v2142_v12  ;;  %2023 = vmatprep.mubr.msk.bf16.mxu1 %vm2247_vm0, %v2246_v0 }
0x13b0   :  { %2021 = vmatprep.subr.bf16.mxu1 %v2246_v0 }
0x13b2   :  { %v1309_v13 = vpop.permute.xlu1 %1308 }
0x13b3   :  { %2022 = vmatpush3.bf16.msra.mxu1 %v2143_v15  ;;  %2016 = vmatmul.mubr.msk.bf16.vlgmr.msra.gmra.mrb[40].mxu0 %vm102_vm4, %v1309_v13 }
0x13b4   :  { %2035 = vmatprep.subr.bf16.mxu1 %v2246_v0  ;;  %2028 = vmatpush3.bf16.msra.mxu0 %v2369_v22 }
0x13b5   :  { %2029 = vmatprep.subr.bf16.mxu0 %v2246_v0  ;;  %2031 = vmatprep.mubr.msk.bf16.mxu0 %vm2247_vm0, %v2246_v0 }
0x13b6   :  { %2024 = vmatmul.mubr.msk.bf16.vlgmr.msra.gmra.mrb[40].mxu1 %vm102_vm4, %v1309_v13 }
0x13b7   :  { %2036 = vmatpush3.bf16.msra.mxu1 %v2371_v23  ;;  %2039 = vmatprep.mubr.msk.bf16.mxu1 %vm2247_vm0, %v2246_v0 }
0x13b8   :  { %2037 = vmatprep.subr.bf16.mxu1 %v2246_v0  ;;  %2030 = vmatpush3.bf16.msra.mxu0 %v2377_v24 }
0x13b9   :  { %2043 = vmatprep.subr.bf16.mxu0 %v2246_v0 }
0x13bb   :  { %2038 = vmatpush3.bf16.msra.mxu1 %v2380_v25 }
0x13bc   :  { %2051 = vmatprep.subr.bf16.mxu1 %v2246_v0 }
0x1481   :  { %v1301_v22 = vpop.f32.mrb[36].mxu1 }
0x1482   :  { %v2009_v16 = vpop.f32.mrb[37].mxu1 }
0x1483   :  { %v1304_v17 = vpop.f32.mrb[38].mxu1 }
0x1484   :  { %v2010_v18 = vpop.f32.mrb[39].mxu1 }
0x1486   :  { %v1347_v19 = vpop.f32.mrb[40].mxu0 }
0x1487   :  { %v1348_v20 = vadd.f32 %v1347_v19, %v1301_v22  ;;  %v2017_v23 = vpop.f32.mrb[41].mxu0 }
0x1488   :  { %v1350_v26 = vpop.f32.mrb[42].mxu0 }
0x1489   :  { %v1353_v27 = vadd.f32 %v2413_v36, %v1348_v20  ;;  %v1410_v28 = vpop.f32.mrb[40].mxu1  ;;  %v2018_v29 = vpop.f32.mrb[43].mxu0  ;;  %v2077_v20 = vld [vmem:[%s2751_s7] sm:$0xff]  }
0x148a   :  { %v1416_v24 = vadd.f32 %v1410_v28, %v1375_v21  ;;  %v2025_v30 = vpop.f32.mrb[41].mxu1 }
0x148b   :  { %2130 = vtanh.f32 %v1353_v27  ;;  %v1413_v1 = vpop.f32.mrb[42].mxu1 }
0x148c   :  { %2132 = vtanh.f32 %v1416_v24  ;;  %v2026_v25 = vpop.f32.mrb[43].mxu1  ;;  %v1767_v1 = vld [vmem:[%s2750_s6] ss:$0 sm:$0xff] }
0x1495   :  { %v2131_v2 = vpop.eup %2130 }
0x1496   :  { %v2133_v31 = vpop.eup %2132  ;;  %v1355_v32 = vadd.f32 1.0, %v2131_v2 }
0x1497   :  { %v1418_v33 = vadd.f32 1.0, %v2133_v31 }
0x1498   :  { %v1356_v34 = vmul.f32 0.5, %v1355_v32 }
0x1499   :  { %v1419_v35 = vmul.f32 0.5, %v1418_v33 }
0x149a   :  { %v1357_v37 = vsel %vm2355_vm3, %v2131_v2, %v1356_v34 }
0x149b   :  { %v1420_v38 = vsel %vm2355_vm3, %v2133_v31, %v1419_v35  ;;  %1360 = vrot.lane.b32.xlu0 %v1357_v37, %s2244_s0  ;;  %v1358_v43 = vmul.f32 %v1357_v37, %v2634_v60 }
0x149c   :  { %1423 = vrot.lane.b32.xlu1 %v1420_v38, %s2244_s0  ;;  %v1421_v44 = vmul.f32 %v1420_v38, %v2638_v62 }
0x150d   :  { %v1361_v39 = vpop.permute.xlu0 %1360 }
0x150e   :  { %v1424_v40 = vpop.permute.xlu1 %1423  ;;  %v1363_v41 = vmul.f32 %v1361_v39, %v1357_v37 }
0x150f   :  { %v1426_v42 = vmul.f32 %v1424_v40, %v1420_v38 }
0x1510   :  { %1365 = vrot.lane.b32.xlu0 %v1363_v41, %s2249_s23 }
0x1511   :  { %1428 = vrot.lane.b32.xlu1 %v1426_v42, %s2249_s23 }
0x1582   :  { %v1366_v45 = vpop.permute.xlu0 %1365 }
0x1583   :  { %v1429_v46 = vpop.permute.xlu1 %1428  ;;  %v1368_v47 = vadd.f32 %v1366_v45, %v1358_v43 }
0x1584   :  { %v1431_v48 = vadd.f32 %v1429_v46, %v1421_v44 }
0x1585   :  { %2134 = vtanh.f32 %v1368_v47 }
0x1586   :  { %2136 = vtanh.f32 %v1431_v48 }
0x158f   :  { %v2135_v49 = vpop.eup %2134 }
0x1590   :  { %v2137_v50 = vpop.eup %2136  ;;  %1371 = vrot.lane.b32.xlu0 %v2135_v49, %s2244_s0 }
0x1591   :  { %1434 = vrot.lane.b32.xlu1 %v2137_v50, %s2244_s0 }
0x1602   :  { %v1372_v51 = vpop.permute.xlu0 %1371 }
0x1603   :  { %v1435_v52 = vpop.permute.xlu1 %1434  ;;  %v1374_v53 = vmul.f32 %v1372_v51, %v1357_v37 }
0x1604   :  { %v1437_v54 = vmul.f32 %v1435_v52, %v1420_v38 }
0x1605   :  { %v1439_v55 = vpack.c.bf16 %v1374_v53, %v1374_v53 }
0x1606   :  { %v1438_v56 = vpack.c.bf16 %v1437_v54, %v1437_v54 }
0x1607   :  { %1441 = vrot.lane.b32.xlu0 %v1439_v55, %s2249_s23 }
0x1608   :  { %1487 = vrot.lane.b32.xlu1 %v1438_v56, %s2249_s23 }
0x1679   :  { %v1442_v57 = vpop.permute.xlu0 %1441 }
0x167a   :  { %v1488_v58 = vpop.permute.xlu1 %1487  ;;  %2032 = vmatmul.mubr.msk.bf16.vlgmr.msra.gmra.mrb[44].mxu0 %vm102_vm4, %v1442_v57 }
0x167b   :  { %2040 = vmatmul.mubr.msk.bf16.vlgmr.msra.gmra.mrb[44].mxu1 %vm102_vm4, %v1488_v58  ;;  %2047 = vmatprep.mubr.msk.bf16.mxu0 %vm2247_vm0, %v2246_v0 }
0x167c   :  { %2053 = vmatprep.mubr.msk.bf16.mxu1 %vm2247_vm0, %v2246_v0  ;;  %2052 = vmatpush3.bf16.msra.mxu1 %v2077_v20 }
0x174d   :  { %v1480_v59 = vpop.f32.mrb[44].mxu0 }
0x174e   :  { %v1526_v60 = vpop.f32.mrb[44].mxu1  ;;  %v2033_v61 = vpop.f32.mrb[45].mxu0 }
0x174f   :  { %v1527_v63 = vadd.f32 %v1526_v60, %v1480_v59  ;;  %v2041_v62 = vpop.f32.mrb[45].mxu1  ;;  %v1483_v3 = vpop.f32.mrb[46].mxu0 }
0x1750   :  { %v1529_v4 = vpop.f32.mrb[46].mxu1  ;;  %v2034_v5 = vpop.f32.mrb[47].mxu0 }
0x1751   :  { %v1532_v6 = vadd.f32 %v2413_v36, %v1527_v63  ;;  %v2042_v7 = vpop.f32.mrb[47].mxu1  ;;  %v2075_v36 = vld [vmem:[%s2749_s5] sm:$0xff]  }
0x1752   :  { %2044 = vmatpush3.bf16.msra.mxu0 %v2075_v36 }
0x1753   :  { %2138 = vtanh.f32 %v1532_v6  ;;  %2045 = vmatprep.subr.bf16.mxu0 %v2246_v0 }
0x1756   :  { %2046 = vmatpush3.bf16.msra.mxu0 %v2076_v14 }
0x175d   :  { %v2139_v8 = vpop.eup %2138 }
0x175e   :  { %v1534_v9 = vadd.f32 1.0, %v2139_v8 }
0x1760   :  { %v1535_v10 = vmul.f32 0.5, %v1534_v9 }
0x1762   :  { %v1536_v11 = vsel %vm2355_vm3, %v2139_v8, %v1535_v10 }
0x1763   :  { %1539 = vrot.lane.b32.xlu0 %v1536_v11, %s2244_s0  ;;  %v1537_v15 = vmul.f32 %v1536_v11, %v1368_v47 }
0x17d5   :  { %v1540_v12 = vpop.permute.xlu0 %1539 }
0x17d6   :  { %v1542_v13 = vmul.f32 %v1540_v12, %v1536_v11 }
0x17d8   :  { %1544 = vrot.lane.b32.xlu1 %v1542_v13, %s2249_s23 }
0x184a   :  { %v1545_v22 = vpop.permute.xlu1 %1544 }
0x184b   :  { %v1547_v16 = vadd.f32 %v1545_v22, %v1537_v15 }
0x184d   :  { %2140 = vtanh.f32 %v1547_v16 }
0x1857   :  { %v2141_v17 = vpop.eup %2140 }
0x1858   :  { %1550 = vrot.lane.b32.xlu0 %v2141_v17, %s2244_s0 }
0x185c   :  { %1687 = vrot.lane.b32.xlu0 %v1437_v54, %s2249_s23 }
0x1860   :  { %1695 = vrot.lane.b32.xlu0 %v1431_v48, %s2249_s23 }
0x18ca   :  { %v1551_v18 = vpop.permute.xlu0 %1550 }
0x18cb   :  { %v1553_v19 = vmul.f32 %v1551_v18, %v1536_v11 }
0x18cd   :  { %v1554_v23 = vpack.c.bf16 %v1553_v19, %v1553_v19 }
0x18ce   :  { %v1688_v21 = vpop.permute.xlu0 %1687 }
0x18cf   :  { %1567 = vrot.lane.b32.xlu1 %v1554_v23, %s2249_s23 }
0x18d2   :  { %v1696_v28 = vpop.permute.xlu0 %1695 }
0x18d3   :  { %1691 = vrot.lane.b32.xlu1 %v1553_v19, %s2244_s0 }
0x18d7   :  { %1699 = vrot.lane.b32.xlu1 %v1547_v16, %s2244_s0  ;;  %s2250_s0 = smov [#allocation8]  }
0x18d8   :  { %s1724_s14 = sshll.u32 %s2250_s0, 4  ;;  %s1725_s14 = int_to_ptr.vmem [resolvable:$true] %s1724_s14 }
0x18d9   :  { %s2188_s18 = scalar_lea.vmem %s1725_s14, 128  ;;  %p2193_p3 = scmp.lt.s32.totalorder %s1725_s14, %s1725_s14 }
0x18da   :  { %p2189_p2 = scmp.ne.s32.totalorder %s1725_s14, %s2188_s18  ;;  %p2194_p4 = scmp.lt.s32.totalorder %s2188_s18, %s2188_s18 }
0x18dc   :  { %p2195_p5 = por %p2194_p4, %p2193_p3 }
0x18de   :  { %p2196_p6 = pnand %p2195_p5, %p2189_p2 }
0x1941   :  { %v1568_v0 = vpop.permute.xlu1 %1567 }
0x1942   :  { %2048 = vmatmul.mubr.msk.bf16.vlgmr.msra.gmra.mrb[48].mxu0 %vm102_vm4, %v1568_v0 }
0x1945   :  { %v1692_v26 = vpop.permute.xlu1 %1691 }
0x1946   :  { %v1702_v27 = vsel %vm102_vm4, %v1688_v21, %v1692_v26 }
0x1947   :  { %v1704_v24 = vsel %vm1703_vm5, %v1702_v27, %v1696_v28 }
0x1949   :  { %v1700_v29 = vpop.permute.xlu1 %1699 }
0x194a   :  { %v1706_v30 = vsel %vm1705_vm6, %v1704_v24, %v1700_v29 }
0x194b   :  { %1707 = vst [vmem:[#allocation8] sm:$0xff] %v1706_v30 }
0x1a15   :  { %v1618_v25 = vpop.f32.mrb[48].mxu0 }
0x1a16   :  { %v1619_v2 = vadd.f32 %v1767_v1, %v1618_v25  ;;  %v2049_v31 = vpop.f32.mrb[49].mxu0 }
0x1a17   :  { %v1621_v32 = vpop.f32.mrb[50].mxu0 }
0x1a18   :  { %v1624_v33 = vmax.f32 %v1619_v2, 0.0  ;;  %v2050_v34 = vpop.f32.mrb[51].mxu0 }
0x1a1a   :  { %v1625_v35 = vpack.c.bf16 %v1624_v33, %v1624_v33 }
0x1a1c   :  { %2054 = vmatmul.mubr.msk.bf16.vlgmr.msra.gmra.mrb[48].mxu1 %vm1641_vm7, %v1625_v35 }
0x1a1d   :  { %2199 = shalt.err (!%p2196_p6)
}
0x1a1e   :  { %s2200_s20 = scalar_lea.hbm %s2754_s10, 128 }
0x1a1f   :  { %p2201_p7 = scmp.ne.s32.totalorder %s2754_s10, %s2200_s20  ;;  %p2204_p8 = scmp.lt.u32.totalorder %s2200_s20, %s2754_s10 }
0x1a21   :  { %p2206_p9 = pnand %p2204_p8, %p2201_p7 }
0x1a23   :  { %2209 = shalt.err (!%p2206_p9)
}
0x1a24   :  { %1727 = dma.vmem_to_hbm [thread:$0]  %s1725_s14, 128, %s2754_s10, [#allocation9]   ;;  %v1771_v37 = vld [vmem:[%s2752_s8] ss:$0 sm:$0xff] }
0x1a25   :  { %s2251_s3 = smov [#allocation7]  }
0x1a26   :  { %s1714_s28 = sshll.u32 %s2251_s3, 4  ;;  %s1715_s28 = int_to_ptr.vmem [resolvable:$true] %s1714_s28 }
0x1a27   :  { %s2210_s4 = scalar_lea.vmem %s1715_s28, 128  ;;  %p2215_p11 = scmp.lt.s32.totalorder %s1715_s28, %s1715_s28 }
0x1a28   :  { %p2211_p10 = scmp.ne.s32.totalorder %s1715_s28, %s2210_s4  ;;  %p2216_p12 = scmp.lt.s32.totalorder %s2210_s4, %s2210_s4 }
0x1a2a   :  { %p2217_p13 = por %p2216_p12, %p2215_p11 }
0x1a2c   :  { %p2218_p0 = pnand %p2217_p13, %p2211_p10 }
0x1aef   :  { %v1679_v38 = vpop.f32.mrb[48].mxu1 }
0x1af0   :  { %v1680_v39 = vadd.f32 %v1771_v37, %v1679_v38  ;;  %v2055_v40 = vpop.f32.mrb[49].mxu1 }
0x1af1   :  { %v1682_v41 = vpop.f32.mrb[50].mxu1 }
0x1af2   :  { %1685 = vst [vmem:[#allocation7] sm:$0xff] %v1680_v39  ;;  %v2056_v42 = vpop.f32.mrb[51].mxu1 }
0x1af3   :  { %2221 = shalt.err (!%p2218_p0)
}
0x1af4   :  { %s2222_s8 = scalar_lea.hbm %s2753_s9, 128 }
0x1af5   :  { %p2223_p1 = scmp.ne.s32.totalorder %s2753_s9, %s2222_s8  ;;  %p2226_p2 = scmp.lt.u32.totalorder %s2222_s8, %s2753_s9 }
0x1af7   :  { %p2228_p3 = pnand %p2226_p2, %p2223_p1 }
0x1af9   :  { %2231 = shalt.err (!%p2228_p3)
}
0x1afa   :  { %1717 = dma.vmem_to_hbm [thread:$0]  %s1715_s28, 128, %s2753_s9, [#allocation4]  }
0x1afb   :  { %2236 = dma.done.wait [#allocation4], 128  }
0x1afc   :  { %2237 = vsyncadd [#allocation4], 4294967168 }
0x1afd   :  { %2238 = dma.done.wait [#allocation9], 128  }
0x1afe   :  { %2239 = vsyncadd [#allocation9], 4294967168 }
0x1aff   :  { %1734 = vsyncpa [#allocation3], 1 }
0x1b00   :  { %1735 = vsyncpa [#allocation6], 1 }
0x1b01   :  { %1736 = vsyncpa [#allocation4], 1 }
0x1b02   :  { %1737 = vsyncpa [#allocation9], 1 }

</bundles_post_ra>
